<compile_context>
chip_gen: v6e
topology: v6e:2x2x1
jax: 0.10.0
libtpu: 0.0.40
codegen_flags: <defaults>
</compile_context>

<pallas_src>
import jax
import jax.numpy as jnp
from jax.experimental import pallas as pl
from jax.experimental.pallas import tpu as pltpu


# ----------------------------------------------------------------------------
# Fused kernel: all layers + FC head in one pallas_call (no grid; everything
# resident in VMEM; default whole-array BlockSpecs DMA each operand once).
# ----------------------------------------------------------------------------
def _make_fused_kernel(n_layers, S, Bp, H):
    H2 = 2 * H
    H8 = 8 * H

    def kernel(*refs):
        x_ref = refs[0]
        layer_refs = refs[1:1 + 3 * n_layers]
        fcw_ref, fcb_ref, out_ref, gx_ref, y_ref = refs[1 + 3 * n_layers:]

        # Lane mask selecting the forward direction's columns of the packed
        # gate layout [i_f i_b | f_f f_b | g_f g_b | o_f o_b].  Hoisted once
        # (JAX does not CSE broadcast_in_dim).
        lane = jax.lax.broadcasted_iota(jnp.int32, (Bp, H8), 1)
        is_fwd = (lane % H2) < H

        h = None
        for layer in range(n_layers):
            wih_ref = layer_refs[3 * layer]
            whh_ref = layer_refs[3 * layer + 1]
            b_ref = layer_refs[3 * layer + 2]
            src_ref = x_ref if layer == 0 else y_ref

            # Hoisted input projection: one MXU call for every timestep and
            # both directions: (S*Bp, IN) @ (IN, 8H) + bias.  No reshapes.
            gx_ref[...] = (jnp.dot(src_ref[...], wih_ref[...],
                                   preferred_element_type=jnp.float32)
                           + b_ref[...])

            whh = whh_ref[...]                       # loop-invariant recurrent W
            h = jnp.zeros((Bp, H2), jnp.float32)     # [h_fwd | h_bwd]
            c = jnp.zeros((Bp, H2), jnp.float32)     # [c_fwd | c_bwd]
            emit_seq = layer < n_layers - 1

            # Fully unrolled static time loop: all ref indexing static, h/c
            # stay in vregs, the serial dependence per step is one
            # (Bp,2H)@(2H,8H) matmul + 3 EUP pushes + a few VPU ops.
            # TODO(synk): hold whh in MXU weight regs via
            # pltpu.matmul_push_rhs/acc_lhs/pop at scaled shapes.
            for u in range(S):
                tb = S - 1 - u                       # backward-direction time
                gx_u = gx_ref[u * Bp:(u + 1) * Bp, :]
                gx_b = gx_u if tb == u else gx_ref[tb * Bp:(tb + 1) * Bp, :]
                gates = (jnp.where(is_fwd, gx_u, gx_b)
                         + jnp.dot(h, whh, preferred_element_type=jnp.float32))

                sig = jax.nn.sigmoid(gates)          # i | f | (g ignored) | o
                g_g = jnp.tanh(gates[:, 2 * H2:3 * H2])
                i_g = sig[:, 0:H2]
                f_g = sig[:, H2:2 * H2]
                o_g = sig[:, 3 * H2:4 * H2]
                c = f_g * c + i_g * g_g
                h = o_g * jnp.tanh(c)

                if emit_seq:
                    # Next layer's input at time t = [h_fwd(t) | h_bwd(t)]:
                    # fwd half stored at time u, bwd half at time tb.
                    # VMEM-only stores (no HBM partial-lane writes).
                    y_ref[u * Bp:(u + 1) * Bp, 0:H] = h[:, 0:H]
                    y_ref[tb * Bp:(tb + 1) * Bp, H:H2] = h[:, H:H2]

        # concat(final fwd h, final bwd h) is exactly `h`; dropout in eval
        # mode is identity; fused Linear head.
        # TODO(synk): PyTorch applies dropout in training mode; eval-mode
        # (identity) semantics implemented here.
        out_ref[...] = (jnp.dot(h, fcw_ref[...],
                                preferred_element_type=jnp.float32)
                        + fcb_ref[...])

    return kernel


# ----------------------------------------------------------------------------
# Parameter init (raw, PyTorch-style) and one-time packing for the kernel.
# ----------------------------------------------------------------------------
def init_params(key, input_size, embedding_size, hidden_size, output_size,
                n_layers):
    params = {}
    k = 1.0 / jnp.sqrt(hidden_size)

    key, sub = jax.random.split(key)
    params["embedding"] = jax.random.normal(
        sub, (input_size, embedding_size), jnp.float32)

    for layer in range(n_layers):
        in_size = embedding_size if layer == 0 else 2 * hidden_size
        for suffix in ("fwd", "bwd"):
            key, k1, k2, k3, k4 = jax.random.split(key, 5)
            params[f"w_ih_l{layer}_{suffix}"] = jax.random.uniform(
                k1, (in_size, 4 * hidden_size), jnp.float32, -k, k)
            params[f"w_hh_l{layer}_{suffix}"] = jax.random.uniform(
                k2, (hidden_size, 4 * hidden_size), jnp.float32, -k, k)
            b_ih = jax.random.uniform(k3, (4 * hidden_size,), jnp.float32, -k, k)
            b_hh = jax.random.uniform(k4, (4 * hidden_size,), jnp.float32, -k, k)
            params[f"b_l{layer}_{suffix}"] = b_ih + b_hh

    key, k1, k2 = jax.random.split(key, 3)
    kf = 1.0 / jnp.sqrt(2 * hidden_size)
    params["fc_w"] = jax.random.uniform(
        k1, (2 * hidden_size, output_size), jnp.float32, -kf, kf)
    params["fc_b"] = jax.random.uniform(k2, (output_size,), jnp.float32, -kf, kf)
    return params


def pack_params(params, n_layers):
    """Host-side weight packing: gate-major, direction-interleaved columns
    [i_f i_b | f_f f_b | g_f g_b | o_f o_b] (each block H wide)."""
    packed = {"embedding": params["embedding"],
              "fc_w": params["fc_w"],
              "fc_b": params["fc_b"].reshape(1, -1)}

    for layer in range(n_layers):
        wf = params[f"w_ih_l{layer}_fwd"]   # (IN, 4H), column blocks i|f|g|o
        wb = params[f"w_ih_l{layer}_bwd"]
        uf = params[f"w_hh_l{layer}_fwd"]   # (H, 4H)
        ub = params[f"w_hh_l{layer}_bwd"]
        bf = params[f"b_l{layer}_fwd"]      # (4H,)
        bb = params[f"b_l{layer}_bwd"]
        H = uf.shape[0]

        def interleave(a, b):
            # (R, 4H), (R, 4H) -> (R, 8H) with gate-major interleaved columns.
            R = a.shape[0]
            return jnp.stack(
                [a.reshape(R, 4, H), b.reshape(R, 4, H)], axis=2
            ).reshape(R, 8 * H)

        packed[f"w_ih_l{layer}"] = interleave(wf, wb)                 # (IN, 8H)
        z = jnp.zeros_like(uf)
        top = interleave(uf, z)    # rows 0:H  -> forward gate columns
        bot = interleave(z, ub)    # rows H:2H -> backward gate columns
        packed[f"w_hh_l{layer}"] = jnp.concatenate([top, bot], axis=0)  # (2H,8H)
        packed[f"b_l{layer}"] = interleave(bf.reshape(1, -1),
                                           bb.reshape(1, -1))           # (1, 8H)
    return packed


# ----------------------------------------------------------------------------
# Forward pass.
# ----------------------------------------------------------------------------
def simple_lstm_forward(packed, text, n_layers):
    """text: (S, B) int32.  Returns (B, output_size) float32."""
    S, B = text.shape
    Bp = max(8, ((B + 7) // 8) * 8)      # pad batch to the 8-sublane granule
    if Bp != B:
        text = jnp.pad(text, ((0, 0), (0, Bp - B)))   # pad cols with token 0

    # Embedding gather is tiny plain-JAX glue; flatten to (S*Bp, E) so the
    # kernel never reshapes (a free row-major reinterpretation here).
    x2d = packed["embedding"][text].reshape(S * Bp, -1)

    H = packed["fc_w"].shape[0] // 2
    O = packed["fc_w"].shape[1]

    args = [x2d]
    for layer in range(n_layers):
        args += [packed[f"w_ih_l{layer}"], packed[f"w_hh_l{layer}"],
                 packed[f"b_l{layer}"]]
    args += [packed["fc_w"], packed["fc_b"]]

    out = pl.pallas_call(
        _make_fused_kernel(n_layers, S, Bp, H),
        out_shape=jax.ShapeDtypeStruct((Bp, O), jnp.float32),
        scratch_shapes=[
            pltpu.VMEM((S * Bp, 8 * H), jnp.float32),   # gate pre-activations
            pltpu.VMEM((S * Bp, 2 * H), jnp.float32),   # inter-layer hidden seq
        ],
    )(*args)
    return out[:B]


# ----------------------------------------------------------------------------
# Pure-JAX reference (for self-check), full-precision matmuls.
# ----------------------------------------------------------------------------
def _ref_lstm_dir(x, w_ih, w_hh, bias):
    hi = jax.lax.Precision.HIGHEST
    S, B, _ = x.shape
    H = w_hh.shape[0]
    h = jnp.zeros((B, H), jnp.float32)
    c = jnp.zeros((B, H), jnp.float32)
    hs = []
    for t in range(S):
        g = (jnp.dot(x[t], w_ih, precision=hi)
             + jnp.dot(h, w_hh, precision=hi) + bias)
        i = jax.nn.sigmoid(g[:, :H])
        f = jax.nn.sigmoid(g[:, H:2 * H])
        gg = jnp.tanh(g[:, 2 * H:3 * H])
        o = jax.nn.sigmoid(g[:, 3 * H:])
        c = f * c + i * gg
        h = o * jnp.tanh(c)
        hs.append(h)
    return jnp.stack(hs), h, c


def _ref_forward(params, text, n_layers):
    hi = jax.lax.Precision.HIGHEST
    x = params["embedding"][text]
    last_fwd_h = last_bwd_h = None
    for layer in range(n_layers):
        f_seq, f_h, _ = _ref_lstm_dir(
            x, params[f"w_ih_l{layer}_fwd"], params[f"w_hh_l{layer}_fwd"],
            params[f"b_l{layer}_fwd"])
        b_seq, b_h, _ = _ref_lstm_dir(
            x[::-1], params[f"w_ih_l{layer}_bwd"], params[f"w_hh_l{layer}_bwd"],
            params[f"b_l{layer}_bwd"])
        x = jnp.concatenate([f_seq, b_seq[::-1]], axis=-1)
        last_fwd_h, last_bwd_h = f_h, b_h
    hidden = jnp.concatenate([last_fwd_h, last_bwd_h], axis=1)
    return jnp.dot(hidden, params["fc_w"], precision=hi) + params["fc_b"]


if __name__ == "__main__":
    # Module hyperparameters (small, consistent with the PyTorch forward).
    INPUT_SIZE = 50        # vocab size
    EMBEDDING_SIZE = 64
    HIDDEN_SIZE = 32
    OUTPUT_SIZE = 8
    N_LAYERS = 2
    SEQ_LEN = 8
    BATCH = 2

    key = jax.random.PRNGKey(0)
    key, pkey, tkey = jax.random.split(key, 3)
    params = init_params(pkey, INPUT_SIZE, EMBEDDING_SIZE, HIDDEN_SIZE,
                         OUTPUT_SIZE, N_LAYERS)
    packed = pack_params(params, N_LAYERS)

    # text: (S, B) int token ids (PyTorch LSTM default is seq-first).
    text = jax.random.randint(tkey, (SEQ_LEN, BATCH), 0, INPUT_SIZE, jnp.int32)

    fwd = jax.jit(simple_lstm_forward, static_argnums=2)
    out = fwd(packed, text, N_LAYERS)
    out = jax.block_until_ready(out)

    ref = _ref_forward(params, text, N_LAYERS)
    assert out.shape == (BATCH, OUTPUT_SIZE)
    assert jnp.allclose(out, ref, atol=1e-4, rtol=1e-4), \
        f"max abs diff {jnp.max(jnp.abs(out - ref))}"

    print("KERNEL_OK")
</pallas_src>

<mosaic_0001>
module attributes {stable_mosaic.version = 11 : i64} {
  func.func @kernel(%arg0: memref<64x64xf32, #tpu.memory_space<vmem>>, %arg1: memref<64x256xf32, #tpu.memory_space<vmem>>, %arg2: memref<64x256xf32, #tpu.memory_space<vmem>>, %arg3: memref<1x256xf32, #tpu.memory_space<vmem>>, %arg4: memref<64x256xf32, #tpu.memory_space<vmem>>, %arg5: memref<64x256xf32, #tpu.memory_space<vmem>>, %arg6: memref<1x256xf32, #tpu.memory_space<vmem>>, %arg7: memref<64x8xf32, #tpu.memory_space<vmem>>, %arg8: memref<1x8xf32, #tpu.memory_space<vmem>>, %arg9: memref<8x8xf32, #tpu.memory_space<vmem>>, %arg10: memref<64x256xf32, #tpu.memory_space<vmem>>, %arg11: memref<64x64xf32, #tpu.memory_space<vmem>>) attributes {dimension_semantics = [], scalar_prefetch = 0 : i64, scratch_operands = 2 : i64, tpu.core_type = #tpu.core_type<tc>} {
    %0 = tpu.iota {dimensions = array<i32: 1>} : vector<8x256xi32>
    %c64_i32 = arith.constant 64 : i32
    %c0_i32 = arith.constant 0 : i32
    %1 = arith.cmpi eq, %c64_i32, %c0_i32 : i32
    %c1_i32 = arith.constant 1 : i32
    %2 = arith.select %1, %c1_i32, %c64_i32 : i32
    %3 = vector.broadcast %2 : i32 to vector<8x256xi32>
    %4 = arith.remsi %0, %3 : vector<8x256xi32>
    %c0_i32_0 = arith.constant 0 : i32
    %5 = vector.broadcast %c0_i32_0 : i32 to vector<8x256xi32>
    %6 = arith.cmpi ne, %4, %5 : vector<8x256xi32>
    %c0_i32_1 = arith.constant 0 : i32
    %7 = vector.broadcast %c0_i32_1 : i32 to vector<8x256xi32>
    %8 = arith.cmpi slt, %4, %7 : vector<8x256xi32>
    %c0_i32_2 = arith.constant 0 : i32
    %9 = arith.cmpi slt, %2, %c0_i32_2 : i32
    %10 = vector.broadcast %9 : i1 to vector<8x256xi1>
    %11 = vector.broadcast %10 : vector<8x256xi1> to vector<8x256xi1>
    %12 = arith.xori %8, %11 : vector<8x256xi1>
    %13 = arith.andi %12, %6 : vector<8x256xi1>
    %14 = vector.broadcast %2 : i32 to vector<8x256xi32>
    %15 = arith.addi %4, %14 : vector<8x256xi32>
    %16 = arith.select %13, %15, %4 : vector<8x256xi1>, vector<8x256xi32>
    %c32_i32 = arith.constant 32 : i32
    %17 = vector.broadcast %c32_i32 : i32 to vector<8x256xi32>
    %18 = arith.cmpi slt, %16, %17 : vector<8x256xi32>
    %c0 = arith.constant 0 : index
    %c0_3 = arith.constant 0 : index
    %19 = vector.load %arg0[%c0, %c0_3] : memref<64x64xf32, #tpu.memory_space<vmem>>, vector<64x64xf32>
    %c0_4 = arith.constant 0 : index
    %c0_5 = arith.constant 0 : index
    %20 = vector.load %arg1[%c0_4, %c0_5] : memref<64x256xf32, #tpu.memory_space<vmem>>, vector<64x256xf32>
    %cst = arith.constant dense<0.000000e+00> : vector<64x256xf32>
    %21 = tpu.matmul %19, %20, %cst {dimension_numbers = #tpu.dot_dimension_numbers<[1], [0], [0], [1], [0, 0, 1, 1], [], []>} : vector<64x64xf32>, vector<64x256xf32>, vector<64x256xf32> -> vector<64x256xf32>
    %c0_6 = arith.constant 0 : index
    %c0_7 = arith.constant 0 : index
    %22 = vector.load %arg3[%c0_6, %c0_7] : memref<1x256xf32, #tpu.memory_space<vmem>>, vector<1x256xf32>
    %23 = vector.broadcast %22 : vector<1x256xf32> to vector<64x256xf32>
    %24 = arith.addf %21, %23 : vector<64x256xf32>
    %c0_8 = arith.constant 0 : index
    %c0_9 = arith.constant 0 : index
    %25 = vector.load %arg10[%c0_8, %c0_9] : memref<64x256xf32, #tpu.memory_space<vmem>>, vector<64x256xf32>
    tpu.vector_store %arg10[%c0_8, %c0_9], %24 {strides = array<i32>} : memref<64x256xf32, #tpu.memory_space<vmem>>, vector<64x256xf32>,
    %c0_10 = arith.constant 0 : index
    %c0_11 = arith.constant 0 : index
    %26 = vector.load %arg2[%c0_10, %c0_11] : memref<64x256xf32, #tpu.memory_space<vmem>>, vector<64x256xf32>
    %cst_12 = arith.constant 0.000000e+00 : f32
    %27 = vector.broadcast %cst_12 : f32 to vector<8x64xf32>
    %cst_13 = arith.constant 0.000000e+00 : f32
    %28 = vector.broadcast %cst_13 : f32 to vector<8x64xf32>
    %c0_14 = arith.constant 0 : index
    %c0_15 = arith.constant 0 : index
    %29 = vector.load %arg10[%c0_14, %c0_15] : memref<64x256xf32, #tpu.memory_space<vmem>>, vector<8x256xf32>
    %c56 = arith.constant 56 : index
    %c0_16 = arith.constant 0 : index
    %30 = vector.load %arg10[%c56, %c0_16] : memref<64x256xf32, #tpu.memory_space<vmem>>, vector<8x256xf32>
    %31 = arith.select %18, %29, %30 : vector<8x256xi1>, vector<8x256xf32>
    %cst_17 = arith.constant dense<0.000000e+00> : vector<8x256xf32>
    %32 = tpu.matmul %27, %26, %cst_17 {dimension_numbers = #tpu.dot_dimension_numbers<[1], [0], [0], [1], [0, 0, 1, 1], [], []>} : vector<8x64xf32>, vector<64x256xf32>, vector<8x256xf32> -> vector<8x256xf32>
    %33 = arith.addf %31, %32 : vector<8x256xf32>
    %34 = arith.negf %33 : vector<8x256xf32>
    %35 = math.exp %34 : vector<8x256xf32>
    %cst_18 = arith.constant 1.000000e+00 : f32
    %36 = vector.broadcast %cst_18 : f32 to vector<8x256xf32>
    %37 = arith.addf %36, %35 : vector<8x256xf32>
    %38 = arith.divf %36, %37 : vector<8x256xf32>
    %39 = vector.extract_strided_slice %33 {offsets = [0, 128], sizes = [8, 64], strides = [1, 1]} : vector<8x256xf32> to vector<8x64xf32>
    %40 = math.tanh %39 : vector<8x64xf32>
    %41 = vector.extract_strided_slice %38 {offsets = [0, 0], sizes = [8, 64], strides = [1, 1]} : vector<8x256xf32> to vector<8x64xf32>
    %42 = vector.extract_strided_slice %38 {offsets = [0, 64], sizes = [8, 64], strides = [1, 1]} : vector<8x256xf32> to vector<8x64xf32>
    %43 = vector.extract_strided_slice %38 {offsets = [0, 192], sizes = [8, 64], strides = [1, 1]} : vector<8x256xf32> to vector<8x64xf32>
    %44 = arith.mulf %42, %28 : vector<8x64xf32>
    %45 = arith.mulf %41, %40 : vector<8x64xf32>
    %46 = arith.addf %44, %45 : vector<8x64xf32>
    %47 = math.tanh %46 : vector<8x64xf32>
    %48 = arith.mulf %43, %47 : vector<8x64xf32>
    %49 = vector.extract_strided_slice %48 {offsets = [0, 0], sizes = [8, 32], strides = [1, 1]} : vector<8x64xf32> to vector<8x32xf32>
    %c0_19 = arith.constant 0 : index
    %c0_20 = arith.constant 0 : index
    %50 = vector.load %arg11[%c0_19, %c0_20] : memref<64x64xf32, #tpu.memory_space<vmem>>, vector<8x32xf32>
    tpu.vector_store %arg11[%c0_19, %c0_20], %49 {strides = array<i32>} : memref<64x64xf32, #tpu.memory_space<vmem>>, vector<8x32xf32>,
    %51 = vector.extract_strided_slice %48 {offsets = [0, 32], sizes = [8, 32], strides = [1, 1]} : vector<8x64xf32> to vector<8x32xf32>
    %c56_21 = arith.constant 56 : index
    %c32 = arith.constant 32 : index
    %52 = vector.load %arg11[%c56_21, %c32] : memref<64x64xf32, #tpu.memory_space<vmem>>, vector<8x32xf32>
    tpu.vector_store %arg11[%c56_21, %c32], %51 {strides = array<i32>} : memref<64x64xf32, #tpu.memory_space<vmem>>, vector<8x32xf32>,
    %c8 = arith.constant 8 : index
    %c0_22 = arith.constant 0 : index
    %53 = vector.load %arg10[%c8, %c0_22] : memref<64x256xf32, #tpu.memory_space<vmem>>, vector<8x256xf32>
    %c48 = arith.constant 48 : index
    %c0_23 = arith.constant 0 : index
    %54 = vector.load %arg10[%c48, %c0_23] : memref<64x256xf32, #tpu.memory_space<vmem>>, vector<8x256xf32>
    %55 = arith.select %18, %53, %54 : vector<8x256xi1>, vector<8x256xf32>
    %cst_24 = arith.constant dense<0.000000e+00> : vector<8x256xf32>
    %56 = tpu.matmul %48, %26, %cst_24 {dimension_numbers = #tpu.dot_dimension_numbers<[1], [0], [0], [1], [0, 0, 1, 1], [], []>} : vector<8x64xf32>, vector<64x256xf32>, vector<8x256xf32> -> vector<8x256xf32>
    %57 = arith.addf %55, %56 : vector<8x256xf32>
    %58 = arith.negf %57 : vector<8x256xf32>
    %59 = math.exp %58 : vector<8x256xf32>
    %cst_25 = arith.constant 1.000000e+00 : f32
    %60 = vector.broadcast %cst_25 : f32 to vector<8x256xf32>
    %61 = arith.addf %60, %59 : vector<8x256xf32>
    %62 = arith.divf %60, %61 : vector<8x256xf32>
    %63 = vector.extract_strided_slice %57 {offsets = [0, 128], sizes = [8, 64], strides = [1, 1]} : vector<8x256xf32> to vector<8x64xf32>
    %64 = math.tanh %63 : vector<8x64xf32>
    %65 = vector.extract_strided_slice %62 {offsets = [0, 0], sizes = [8, 64], strides = [1, 1]} : vector<8x256xf32> to vector<8x64xf32>
    %66 = vector.extract_strided_slice %62 {offsets = [0, 64], sizes = [8, 64], strides = [1, 1]} : vector<8x256xf32> to vector<8x64xf32>
    %67 = vector.extract_strided_slice %62 {offsets = [0, 192], sizes = [8, 64], strides = [1, 1]} : vector<8x256xf32> to vector<8x64xf32>
    %68 = arith.mulf %66, %46 : vector<8x64xf32>
    %69 = arith.mulf %65, %64 : vector<8x64xf32>
    %70 = arith.addf %68, %69 : vector<8x64xf32>
    %71 = math.tanh %70 : vector<8x64xf32>
    %72 = arith.mulf %67, %71 : vector<8x64xf32>
    %73 = vector.extract_strided_slice %72 {offsets = [0, 0], sizes = [8, 32], strides = [1, 1]} : vector<8x64xf32> to vector<8x32xf32>
    %c8_26 = arith.constant 8 : index
    %c0_27 = arith.constant 0 : index
    %74 = vector.load %arg11[%c8_26, %c0_27] : memref<64x64xf32, #tpu.memory_space<vmem>>, vector<8x32xf32>
    tpu.vector_store %arg11[%c8_26, %c0_27], %73 {strides = array<i32>} : memref<64x64xf32, #tpu.memory_space<vmem>>, vector<8x32xf32>,
    %75 = vector.extract_strided_slice %72 {offsets = [0, 32], sizes = [8, 32], strides = [1, 1]} : vector<8x64xf32> to vector<8x32xf32>
    %c48_28 = arith.constant 48 : index
    %c32_29 = arith.constant 32 : index
    %76 = vector.load %arg11[%c48_28, %c32_29] : memref<64x64xf32, #tpu.memory_space<vmem>>, vector<8x32xf32>
    tpu.vector_store %arg11[%c48_28, %c32_29], %75 {strides = array<i32>} : memref<64x64xf32, #tpu.memory_space<vmem>>, vector<8x32xf32>,
    %c16 = arith.constant 16 : index
    %c0_30 = arith.constant 0 : index
    %77 = vector.load %arg10[%c16, %c0_30] : memref<64x256xf32, #tpu.memory_space<vmem>>, vector<8x256xf32>
    %c40 = arith.constant 40 : index
    %c0_31 = arith.constant 0 : index
    %78 = vector.load %arg10[%c40, %c0_31] : memref<64x256xf32, #tpu.memory_space<vmem>>, vector<8x256xf32>
    %79 = arith.select %18, %77, %78 : vector<8x256xi1>, vector<8x256xf32>
    %cst_32 = arith.constant dense<0.000000e+00> : vector<8x256xf32>
    %80 = tpu.matmul %72, %26, %cst_32 {dimension_numbers = #tpu.dot_dimension_numbers<[1], [0], [0], [1], [0, 0, 1, 1], [], []>} : vector<8x64xf32>, vector<64x256xf32>, vector<8x256xf32> -> vector<8x256xf32>
    %81 = arith.addf %79, %80 : vector<8x256xf32>
    %82 = arith.negf %81 : vector<8x256xf32>
    %83 = math.exp %82 : vector<8x256xf32>
    %cst_33 = arith.constant 1.000000e+00 : f32
    %84 = vector.broadcast %cst_33 : f32 to vector<8x256xf32>
    %85 = arith.addf %84, %83 : vector<8x256xf32>
    %86 = arith.divf %84, %85 : vector<8x256xf32>
    %87 = vector.extract_strided_slice %81 {offsets = [0, 128], sizes = [8, 64], strides = [1, 1]} : vector<8x256xf32> to vector<8x64xf32>
    %88 = math.tanh %87 : vector<8x64xf32>
    %89 = vector.extract_strided_slice %86 {offsets = [0, 0], sizes = [8, 64], strides = [1, 1]} : vector<8x256xf32> to vector<8x64xf32>
    %90 = vector.extract_strided_slice %86 {offsets = [0, 64], sizes = [8, 64], strides = [1, 1]} : vector<8x256xf32> to vector<8x64xf32>
    %91 = vector.extract_strided_slice %86 {offsets = [0, 192], sizes = [8, 64], strides = [1, 1]} : vector<8x256xf32> to vector<8x64xf32>
    %92 = arith.mulf %90, %70 : vector<8x64xf32>
    %93 = arith.mulf %89, %88 : vector<8x64xf32>
    %94 = arith.addf %92, %93 : vector<8x64xf32>
    %95 = math.tanh %94 : vector<8x64xf32>
    %96 = arith.mulf %91, %95 : vector<8x64xf32>
    %97 = vector.extract_strided_slice %96 {offsets = [0, 0], sizes = [8, 32], strides = [1, 1]} : vector<8x64xf32> to vector<8x32xf32>
    %c16_34 = arith.constant 16 : index
    %c0_35 = arith.constant 0 : index
    %98 = vector.load %arg11[%c16_34, %c0_35] : memref<64x64xf32, #tpu.memory_space<vmem>>, vector<8x32xf32>
    tpu.vector_store %arg11[%c16_34, %c0_35], %97 {strides = array<i32>} : memref<64x64xf32, #tpu.memory_space<vmem>>, vector<8x32xf32>,
    %99 = vector.extract_strided_slice %96 {offsets = [0, 32], sizes = [8, 32], strides = [1, 1]} : vector<8x64xf32> to vector<8x32xf32>
    %c40_36 = arith.constant 40 : index
    %c32_37 = arith.constant 32 : index
    %100 = vector.load %arg11[%c40_36, %c32_37] : memref<64x64xf32, #tpu.memory_space<vmem>>, vector<8x32xf32>
    tpu.vector_store %arg11[%c40_36, %c32_37], %99 {strides = array<i32>} : memref<64x64xf32, #tpu.memory_space<vmem>>, vector<8x32xf32>,
    %c24 = arith.constant 24 : index
    %c0_38 = arith.constant 0 : index
    %101 = vector.load %arg10[%c24, %c0_38] : memref<64x256xf32, #tpu.memory_space<vmem>>, vector<8x256xf32>
    %c32_39 = arith.constant 32 : index
    %c0_40 = arith.constant 0 : index
    %102 = vector.load %arg10[%c32_39, %c0_40] : memref<64x256xf32, #tpu.memory_space<vmem>>, vector<8x256xf32>
    %103 = arith.select %18, %101, %102 : vector<8x256xi1>, vector<8x256xf32>
    %cst_41 = arith.constant dense<0.000000e+00> : vector<8x256xf32>
    %104 = tpu.matmul %96, %26, %cst_41 {dimension_numbers = #tpu.dot_dimension_numbers<[1], [0], [0], [1], [0, 0, 1, 1], [], []>} : vector<8x64xf32>, vector<64x256xf32>, vector<8x256xf32> -> vector<8x256xf32>
    %105 = arith.addf %103, %104 : vector<8x256xf32>
    %106 = arith.negf %105 : vector<8x256xf32>
    %107 = math.exp %106 : vector<8x256xf32>
    %cst_42 = arith.constant 1.000000e+00 : f32
    %108 = vector.broadcast %cst_42 : f32 to vector<8x256xf32>
    %109 = arith.addf %108, %107 : vector<8x256xf32>
    %110 = arith.divf %108, %109 : vector<8x256xf32>
    %111 = vector.extract_strided_slice %105 {offsets = [0, 128], sizes = [8, 64], strides = [1, 1]} : vector<8x256xf32> to vector<8x64xf32>
    %112 = math.tanh %111 : vector<8x64xf32>
    %113 = vector.extract_strided_slice %110 {offsets = [0, 0], sizes = [8, 64], strides = [1, 1]} : vector<8x256xf32> to vector<8x64xf32>
    %114 = vector.extract_strided_slice %110 {offsets = [0, 64], sizes = [8, 64], strides = [1, 1]} : vector<8x256xf32> to vector<8x64xf32>
    %115 = vector.extract_strided_slice %110 {offsets = [0, 192], sizes = [8, 64], strides = [1, 1]} : vector<8x256xf32> to vector<8x64xf32>
    %116 = arith.mulf %114, %94 : vector<8x64xf32>
    %117 = arith.mulf %113, %112 : vector<8x64xf32>
    %118 = arith.addf %116, %117 : vector<8x64xf32>
    %119 = math.tanh %118 : vector<8x64xf32>
    %120 = arith.mulf %115, %119 : vector<8x64xf32>
    %121 = vector.extract_strided_slice %120 {offsets = [0, 0], sizes = [8, 32], strides = [1, 1]} : vector<8x64xf32> to vector<8x32xf32>
    %c24_43 = arith.constant 24 : index
    %c0_44 = arith.constant 0 : index
    %122 = vector.load %arg11[%c24_43, %c0_44] : memref<64x64xf32, #tpu.memory_space<vmem>>, vector<8x32xf32>
    tpu.vector_store %arg11[%c24_43, %c0_44], %121 {strides = array<i32>} : memref<64x64xf32, #tpu.memory_space<vmem>>, vector<8x32xf32>,
    %123 = vector.extract_strided_slice %120 {offsets = [0, 32], sizes = [8, 32], strides = [1, 1]} : vector<8x64xf32> to vector<8x32xf32>
    %c32_45 = arith.constant 32 : index
    %c32_46 = arith.constant 32 : index
    %124 = vector.load %arg11[%c32_45, %c32_46] : memref<64x64xf32, #tpu.memory_space<vmem>>, vector<8x32xf32>
    tpu.vector_store %arg11[%c32_45, %c32_46], %123 {strides = array<i32>} : memref<64x64xf32, #tpu.memory_space<vmem>>, vector<8x32xf32>,
    %c32_47 = arith.constant 32 : index
    %c0_48 = arith.constant 0 : index
    %125 = vector.load %arg10[%c32_47, %c0_48] : memref<64x256xf32, #tpu.memory_space<vmem>>, vector<8x256xf32>
    %c24_49 = arith.constant 24 : index
    %c0_50 = arith.constant 0 : index
    %126 = vector.load %arg10[%c24_49, %c0_50] : memref<64x256xf32, #tpu.memory_space<vmem>>, vector<8x256xf32>
    %127 = arith.select %18, %125, %126 : vector<8x256xi1>, vector<8x256xf32>
    %cst_51 = arith.constant dense<0.000000e+00> : vector<8x256xf32>
    %128 = tpu.matmul %120, %26, %cst_51 {dimension_numbers = #tpu.dot_dimension_numbers<[1], [0], [0], [1], [0, 0, 1, 1], [], []>} : vector<8x64xf32>, vector<64x256xf32>, vector<8x256xf32> -> vector<8x256xf32>
    %129 = arith.addf %127, %128 : vector<8x256xf32>
    %130 = arith.negf %129 : vector<8x256xf32>
    %131 = math.exp %130 : vector<8x256xf32>
    %cst_52 = arith.constant 1.000000e+00 : f32
    %132 = vector.broadcast %cst_52 : f32 to vector<8x256xf32>
    %133 = arith.addf %132, %131 : vector<8x256xf32>
    %134 = arith.divf %132, %133 : vector<8x256xf32>
    %135 = vector.extract_strided_slice %129 {offsets = [0, 128], sizes = [8, 64], strides = [1, 1]} : vector<8x256xf32> to vector<8x64xf32>
    %136 = math.tanh %135 : vector<8x64xf32>
    %137 = vector.extract_strided_slice %134 {offsets = [0, 0], sizes = [8, 64], strides = [1, 1]} : vector<8x256xf32> to vector<8x64xf32>
    %138 = vector.extract_strided_slice %134 {offsets = [0, 64], sizes = [8, 64], strides = [1, 1]} : vector<8x256xf32> to vector<8x64xf32>
    %139 = vector.extract_strided_slice %134 {offsets = [0, 192], sizes = [8, 64], strides = [1, 1]} : vector<8x256xf32> to vector<8x64xf32>
    %140 = arith.mulf %138, %118 : vector<8x64xf32>
    %141 = arith.mulf %137, %136 : vector<8x64xf32>
    %142 = arith.addf %140, %141 : vector<8x64xf32>
    %143 = math.tanh %142 : vector<8x64xf32>
    %144 = arith.mulf %139, %143 : vector<8x64xf32>
    %145 = vector.extract_strided_slice %144 {offsets = [0, 0], sizes = [8, 32], strides = [1, 1]} : vector<8x64xf32> to vector<8x32xf32>
    %c32_53 = arith.constant 32 : index
    %c0_54 = arith.constant 0 : index
    %146 = vector.load %arg11[%c32_53, %c0_54] : memref<64x64xf32, #tpu.memory_space<vmem>>, vector<8x32xf32>
    tpu.vector_store %arg11[%c32_53, %c0_54], %145 {strides = array<i32>} : memref<64x64xf32, #tpu.memory_space<vmem>>, vector<8x32xf32>,
    %147 = vector.extract_strided_slice %144 {offsets = [0, 32], sizes = [8, 32], strides = [1, 1]} : vector<8x64xf32> to vector<8x32xf32>
    %c24_55 = arith.constant 24 : index
    %c32_56 = arith.constant 32 : index
    %148 = vector.load %arg11[%c24_55, %c32_56] : memref<64x64xf32, #tpu.memory_space<vmem>>, vector<8x32xf32>
    tpu.vector_store %arg11[%c24_55, %c32_56], %147 {strides = array<i32>} : memref<64x64xf32, #tpu.memory_space<vmem>>, vector<8x32xf32>,
    %c40_57 = arith.constant 40 : index
    %c0_58 = arith.constant 0 : index
    %149 = vector.load %arg10[%c40_57, %c0_58] : memref<64x256xf32, #tpu.memory_space<vmem>>, vector<8x256xf32>
    %c16_59 = arith.constant 16 : index
    %c0_60 = arith.constant 0 : index
    %150 = vector.load %arg10[%c16_59, %c0_60] : memref<64x256xf32, #tpu.memory_space<vmem>>, vector<8x256xf32>
    %151 = arith.select %18, %149, %150 : vector<8x256xi1>, vector<8x256xf32>
    %cst_61 = arith.constant dense<0.000000e+00> : vector<8x256xf32>
    %152 = tpu.matmul %144, %26, %cst_61 {dimension_numbers = #tpu.dot_dimension_numbers<[1], [0], [0], [1], [0, 0, 1, 1], [], []>} : vector<8x64xf32>, vector<64x256xf32>, vector<8x256xf32> -> vector<8x256xf32>
    %153 = arith.addf %151, %152 : vector<8x256xf32>
    %154 = arith.negf %153 : vector<8x256xf32>
    %155 = math.exp %154 : vector<8x256xf32>
    %cst_62 = arith.constant 1.000000e+00 : f32
    %156 = vector.broadcast %cst_62 : f32 to vector<8x256xf32>
    %157 = arith.addf %156, %155 : vector<8x256xf32>
    %158 = arith.divf %156, %157 : vector<8x256xf32>
    %159 = vector.extract_strided_slice %153 {offsets = [0, 128], sizes = [8, 64], strides = [1, 1]} : vector<8x256xf32> to vector<8x64xf32>
    %160 = math.tanh %159 : vector<8x64xf32>
    %161 = vector.extract_strided_slice %158 {offsets = [0, 0], sizes = [8, 64], strides = [1, 1]} : vector<8x256xf32> to vector<8x64xf32>
    %162 = vector.extract_strided_slice %158 {offsets = [0, 64], sizes = [8, 64], strides = [1, 1]} : vector<8x256xf32> to vector<8x64xf32>
    %163 = vector.extract_strided_slice %158 {offsets = [0, 192], sizes = [8, 64], strides = [1, 1]} : vector<8x256xf32> to vector<8x64xf32>
    %164 = arith.mulf %162, %142 : vector<8x64xf32>
    %165 = arith.mulf %161, %160 : vector<8x64xf32>
    %166 = arith.addf %164, %165 : vector<8x64xf32>
    %167 = math.tanh %166 : vector<8x64xf32>
    %168 = arith.mulf %163, %167 : vector<8x64xf32>
    %169 = vector.extract_strided_slice %168 {offsets = [0, 0], sizes = [8, 32], strides = [1, 1]} : vector<8x64xf32> to vector<8x32xf32>
    %c40_63 = arith.constant 40 : index
    %c0_64 = arith.constant 0 : index
    %170 = vector.load %arg11[%c40_63, %c0_64] : memref<64x64xf32, #tpu.memory_space<vmem>>, vector<8x32xf32>
    tpu.vector_store %arg11[%c40_63, %c0_64], %169 {strides = array<i32>} : memref<64x64xf32, #tpu.memory_space<vmem>>, vector<8x32xf32>,
    %171 = vector.extract_strided_slice %168 {offsets = [0, 32], sizes = [8, 32], strides = [1, 1]} : vector<8x64xf32> to vector<8x32xf32>
    %c16_65 = arith.constant 16 : index
    %c32_66 = arith.constant 32 : index
    %172 = vector.load %arg11[%c16_65, %c32_66] : memref<64x64xf32, #tpu.memory_space<vmem>>, vector<8x32xf32>
    tpu.vector_store %arg11[%c16_65, %c32_66], %171 {strides = array<i32>} : memref<64x64xf32, #tpu.memory_space<vmem>>, vector<8x32xf32>,
    %c48_67 = arith.constant 48 : index
    %c0_68 = arith.constant 0 : index
    %173 = vector.load %arg10[%c48_67, %c0_68] : memref<64x256xf32, #tpu.memory_space<vmem>>, vector<8x256xf32>
    %c8_69 = arith.constant 8 : index
    %c0_70 = arith.constant 0 : index
    %174 = vector.load %arg10[%c8_69, %c0_70] : memref<64x256xf32, #tpu.memory_space<vmem>>, vector<8x256xf32>
    %175 = arith.select %18, %173, %174 : vector<8x256xi1>, vector<8x256xf32>
    %cst_71 = arith.constant dense<0.000000e+00> : vector<8x256xf32>
    %176 = tpu.matmul %168, %26, %cst_71 {dimension_numbers = #tpu.dot_dimension_numbers<[1], [0], [0], [1], [0, 0, 1, 1], [], []>} : vector<8x64xf32>, vector<64x256xf32>, vector<8x256xf32> -> vector<8x256xf32>
    %177 = arith.addf %175, %176 : vector<8x256xf32>
    %178 = arith.negf %177 : vector<8x256xf32>
    %179 = math.exp %178 : vector<8x256xf32>
    %cst_72 = arith.constant 1.000000e+00 : f32
    %180 = vector.broadcast %cst_72 : f32 to vector<8x256xf32>
    %181 = arith.addf %180, %179 : vector<8x256xf32>
    %182 = arith.divf %180, %181 : vector<8x256xf32>
    %183 = vector.extract_strided_slice %177 {offsets = [0, 128], sizes = [8, 64], strides = [1, 1]} : vector<8x256xf32> to vector<8x64xf32>
    %184 = math.tanh %183 : vector<8x64xf32>
    %185 = vector.extract_strided_slice %182 {offsets = [0, 0], sizes = [8, 64], strides = [1, 1]} : vector<8x256xf32> to vector<8x64xf32>
    %186 = vector.extract_strided_slice %182 {offsets = [0, 64], sizes = [8, 64], strides = [1, 1]} : vector<8x256xf32> to vector<8x64xf32>
    %187 = vector.extract_strided_slice %182 {offsets = [0, 192], sizes = [8, 64], strides = [1, 1]} : vector<8x256xf32> to vector<8x64xf32>
    %188 = arith.mulf %186, %166 : vector<8x64xf32>
    %189 = arith.mulf %185, %184 : vector<8x64xf32>
    %190 = arith.addf %188, %189 : vector<8x64xf32>
    %191 = math.tanh %190 : vector<8x64xf32>
    %192 = arith.mulf %187, %191 : vector<8x64xf32>
    %193 = vector.extract_strided_slice %192 {offsets = [0, 0], sizes = [8, 32], strides = [1, 1]} : vector<8x64xf32> to vector<8x32xf32>
    %c48_73 = arith.constant 48 : index
    %c0_74 = arith.constant 0 : index
    %194 = vector.load %arg11[%c48_73, %c0_74] : memref<64x64xf32, #tpu.memory_space<vmem>>, vector<8x32xf32>
    tpu.vector_store %arg11[%c48_73, %c0_74], %193 {strides = array<i32>} : memref<64x64xf32, #tpu.memory_space<vmem>>, vector<8x32xf32>,
    %195 = vector.extract_strided_slice %192 {offsets = [0, 32], sizes = [8, 32], strides = [1, 1]} : vector<8x64xf32> to vector<8x32xf32>
    %c8_75 = arith.constant 8 : index
    %c32_76 = arith.constant 32 : index
    %196 = vector.load %arg11[%c8_75, %c32_76] : memref<64x64xf32, #tpu.memory_space<vmem>>, vector<8x32xf32>
    tpu.vector_store %arg11[%c8_75, %c32_76], %195 {strides = array<i32>} : memref<64x64xf32, #tpu.memory_space<vmem>>, vector<8x32xf32>,
    %c56_77 = arith.constant 56 : index
    %c0_78 = arith.constant 0 : index
    %197 = vector.load %arg10[%c56_77, %c0_78] : memref<64x256xf32, #tpu.memory_space<vmem>>, vector<8x256xf32>
    %c0_79 = arith.constant 0 : index
    %c0_80 = arith.constant 0 : index
    %198 = vector.load %arg10[%c0_79, %c0_80] : memref<64x256xf32, #tpu.memory_space<vmem>>, vector<8x256xf32>
    %199 = arith.select %18, %197, %198 : vector<8x256xi1>, vector<8x256xf32>
    %cst_81 = arith.constant dense<0.000000e+00> : vector<8x256xf32>
    %200 = tpu.matmul %192, %26, %cst_81 {dimension_numbers = #tpu.dot_dimension_numbers<[1], [0], [0], [1], [0, 0, 1, 1], [], []>} : vector<8x64xf32>, vector<64x256xf32>, vector<8x256xf32> -> vector<8x256xf32>
    %201 = arith.addf %199, %200 : vector<8x256xf32>
    %202 = arith.negf %201 : vector<8x256xf32>
    %203 = math.exp %202 : vector<8x256xf32>
    %cst_82 = arith.constant 1.000000e+00 : f32
    %204 = vector.broadcast %cst_82 : f32 to vector<8x256xf32>
    %205 = arith.addf %204, %203 : vector<8x256xf32>
    %206 = arith.divf %204, %205 : vector<8x256xf32>
    %207 = vector.extract_strided_slice %201 {offsets = [0, 128], sizes = [8, 64], strides = [1, 1]} : vector<8x256xf32> to vector<8x64xf32>
    %208 = math.tanh %207 : vector<8x64xf32>
    %209 = vector.extract_strided_slice %206 {offsets = [0, 0], sizes = [8, 64], strides = [1, 1]} : vector<8x256xf32> to vector<8x64xf32>
    %210 = vector.extract_strided_slice %206 {offsets = [0, 64], sizes = [8, 64], strides = [1, 1]} : vector<8x256xf32> to vector<8x64xf32>
    %211 = vector.extract_strided_slice %206 {offsets = [0, 192], sizes = [8, 64], strides = [1, 1]} : vector<8x256xf32> to vector<8x64xf32>
    %212 = arith.mulf %210, %190 : vector<8x64xf32>
    %213 = arith.mulf %209, %208 : vector<8x64xf32>
    %214 = arith.addf %212, %213 : vector<8x64xf32>
    %215 = math.tanh %214 : vector<8x64xf32>
    %216 = arith.mulf %211, %215 : vector<8x64xf32>
    %217 = vector.extract_strided_slice %216 {offsets = [0, 0], sizes = [8, 32], strides = [1, 1]} : vector<8x64xf32> to vector<8x32xf32>
    %c56_83 = arith.constant 56 : index
    %c0_84 = arith.constant 0 : index
    %218 = vector.load %arg11[%c56_83, %c0_84] : memref<64x64xf32, #tpu.memory_space<vmem>>, vector<8x32xf32>
    tpu.vector_store %arg11[%c56_83, %c0_84], %217 {strides = array<i32>} : memref<64x64xf32, #tpu.memory_space<vmem>>, vector<8x32xf32>,
    %219 = vector.extract_strided_slice %216 {offsets = [0, 32], sizes = [8, 32], strides = [1, 1]} : vector<8x64xf32> to vector<8x32xf32>
    %c0_85 = arith.constant 0 : index
    %c32_86 = arith.constant 32 : index
    %220 = vector.load %arg11[%c0_85, %c32_86] : memref<64x64xf32, #tpu.memory_space<vmem>>, vector<8x32xf32>
    tpu.vector_store %arg11[%c0_85, %c32_86], %219 {strides = array<i32>} : memref<64x64xf32, #tpu.memory_space<vmem>>, vector<8x32xf32>,
    %c0_87 = arith.constant 0 : index
    %c0_88 = arith.constant 0 : index
    %221 = vector.load %arg11[%c0_87, %c0_88] : memref<64x64xf32, #tpu.memory_space<vmem>>, vector<64x64xf32>
    %c0_89 = arith.constant 0 : index
    %c0_90 = arith.constant 0 : index
    %222 = vector.load %arg4[%c0_89, %c0_90] : memref<64x256xf32, #tpu.memory_space<vmem>>, vector<64x256xf32>
    %cst_91 = arith.constant dense<0.000000e+00> : vector<64x256xf32>
    %223 = tpu.matmul %221, %222, %cst_91 {dimension_numbers = #tpu.dot_dimension_numbers<[1], [0], [0], [1], [0, 0, 1, 1], [], []>} : vector<64x64xf32>, vector<64x256xf32>, vector<64x256xf32> -> vector<64x256xf32>
    %c0_92 = arith.constant 0 : index
    %c0_93 = arith.constant 0 : index
    %224 = vector.load %arg6[%c0_92, %c0_93] : memref<1x256xf32, #tpu.memory_space<vmem>>, vector<1x256xf32>
    %225 = vector.broadcast %224 : vector<1x256xf32> to vector<64x256xf32>
    %226 = arith.addf %223, %225 : vector<64x256xf32>
    %c0_94 = arith.constant 0 : index
    %c0_95 = arith.constant 0 : index
    %227 = vector.load %arg10[%c0_94, %c0_95] : memref<64x256xf32, #tpu.memory_space<vmem>>, vector<64x256xf32>
    tpu.vector_store %arg10[%c0_94, %c0_95], %226 {strides = array<i32>} : memref<64x256xf32, #tpu.memory_space<vmem>>, vector<64x256xf32>,
    %c0_96 = arith.constant 0 : index
    %c0_97 = arith.constant 0 : index
    %228 = vector.load %arg5[%c0_96, %c0_97] : memref<64x256xf32, #tpu.memory_space<vmem>>, vector<64x256xf32>
    %cst_98 = arith.constant 0.000000e+00 : f32
    %229 = vector.broadcast %cst_98 : f32 to vector<8x64xf32>
    %cst_99 = arith.constant 0.000000e+00 : f32
    %230 = vector.broadcast %cst_99 : f32 to vector<8x64xf32>
    %c0_100 = arith.constant 0 : index
    %c0_101 = arith.constant 0 : index
    %231 = vector.load %arg10[%c0_100, %c0_101] : memref<64x256xf32, #tpu.memory_space<vmem>>, vector<8x256xf32>
    %c56_102 = arith.constant 56 : index
    %c0_103 = arith.constant 0 : index
    %232 = vector.load %arg10[%c56_102, %c0_103] : memref<64x256xf32, #tpu.memory_space<vmem>>, vector<8x256xf32>
    %233 = arith.select %18, %231, %232 : vector<8x256xi1>, vector<8x256xf32>
    %cst_104 = arith.constant dense<0.000000e+00> : vector<8x256xf32>
    %234 = tpu.matmul %229, %228, %cst_104 {dimension_numbers = #tpu.dot_dimension_numbers<[1], [0], [0], [1], [0, 0, 1, 1], [], []>} : vector<8x64xf32>, vector<64x256xf32>, vector<8x256xf32> -> vector<8x256xf32>
    %235 = arith.addf %233, %234 : vector<8x256xf32>
    %236 = arith.negf %235 : vector<8x256xf32>
    %237 = math.exp %236 : vector<8x256xf32>
    %cst_105 = arith.constant 1.000000e+00 : f32
    %238 = vector.broadcast %cst_105 : f32 to vector<8x256xf32>
    %239 = arith.addf %238, %237 : vector<8x256xf32>
    %240 = arith.divf %238, %239 : vector<8x256xf32>
    %241 = vector.extract_strided_slice %235 {offsets = [0, 128], sizes = [8, 64], strides = [1, 1]} : vector<8x256xf32> to vector<8x64xf32>
    %242 = math.tanh %241 : vector<8x64xf32>
    %243 = vector.extract_strided_slice %240 {offsets = [0, 0], sizes = [8, 64], strides = [1, 1]} : vector<8x256xf32> to vector<8x64xf32>
    %244 = vector.extract_strided_slice %240 {offsets = [0, 64], sizes = [8, 64], strides = [1, 1]} : vector<8x256xf32> to vector<8x64xf32>
    %245 = vector.extract_strided_slice %240 {offsets = [0, 192], sizes = [8, 64], strides = [1, 1]} : vector<8x256xf32> to vector<8x64xf32>
    %246 = arith.mulf %244, %230 : vector<8x64xf32>
    %247 = arith.mulf %243, %242 : vector<8x64xf32>
    %248 = arith.addf %246, %247 : vector<8x64xf32>
    %249 = math.tanh %248 : vector<8x64xf32>
    %250 = arith.mulf %245, %249 : vector<8x64xf32>
    %c8_106 = arith.constant 8 : index
    %c0_107 = arith.constant 0 : index
    %251 = vector.load %arg10[%c8_106, %c0_107] : memref<64x256xf32, #tpu.memory_space<vmem>>, vector<8x256xf32>
    %c48_108 = arith.constant 48 : index
    %c0_109 = arith.constant 0 : index
    %252 = vector.load %arg10[%c48_108, %c0_109] : memref<64x256xf32, #tpu.memory_space<vmem>>, vector<8x256xf32>
    %253 = arith.select %18, %251, %252 : vector<8x256xi1>, vector<8x256xf32>
    %cst_110 = arith.constant dense<0.000000e+00> : vector<8x256xf32>
    %254 = tpu.matmul %250, %228, %cst_110 {dimension_numbers = #tpu.dot_dimension_numbers<[1], [0], [0], [1], [0, 0, 1, 1], [], []>} : vector<8x64xf32>, vector<64x256xf32>, vector<8x256xf32> -> vector<8x256xf32>
    %255 = arith.addf %253, %254 : vector<8x256xf32>
    %256 = arith.negf %255 : vector<8x256xf32>
    %257 = math.exp %256 : vector<8x256xf32>
    %cst_111 = arith.constant 1.000000e+00 : f32
    %258 = vector.broadcast %cst_111 : f32 to vector<8x256xf32>
    %259 = arith.addf %258, %257 : vector<8x256xf32>
    %260 = arith.divf %258, %259 : vector<8x256xf32>
    %261 = vector.extract_strided_slice %255 {offsets = [0, 128], sizes = [8, 64], strides = [1, 1]} : vector<8x256xf32> to vector<8x64xf32>
    %262 = math.tanh %261 : vector<8x64xf32>
    %263 = vector.extract_strided_slice %260 {offsets = [0, 0], sizes = [8, 64], strides = [1, 1]} : vector<8x256xf32> to vector<8x64xf32>
    %264 = vector.extract_strided_slice %260 {offsets = [0, 64], sizes = [8, 64], strides = [1, 1]} : vector<8x256xf32> to vector<8x64xf32>
    %265 = vector.extract_strided_slice %260 {offsets = [0, 192], sizes = [8, 64], strides = [1, 1]} : vector<8x256xf32> to vector<8x64xf32>
    %266 = arith.mulf %264, %248 : vector<8x64xf32>
    %267 = arith.mulf %263, %262 : vector<8x64xf32>
    %268 = arith.addf %266, %267 : vector<8x64xf32>
    %269 = math.tanh %268 : vector<8x64xf32>
    %270 = arith.mulf %265, %269 : vector<8x64xf32>
    %c16_112 = arith.constant 16 : index
    %c0_113 = arith.constant 0 : index
    %271 = vector.load %arg10[%c16_112, %c0_113] : memref<64x256xf32, #tpu.memory_space<vmem>>, vector<8x256xf32>
    %c40_114 = arith.constant 40 : index
    %c0_115 = arith.constant 0 : index
    %272 = vector.load %arg10[%c40_114, %c0_115] : memref<64x256xf32, #tpu.memory_space<vmem>>, vector<8x256xf32>
    %273 = arith.select %18, %271, %272 : vector<8x256xi1>, vector<8x256xf32>
    %cst_116 = arith.constant dense<0.000000e+00> : vector<8x256xf32>
    %274 = tpu.matmul %270, %228, %cst_116 {dimension_numbers = #tpu.dot_dimension_numbers<[1], [0], [0], [1], [0, 0, 1, 1], [], []>} : vector<8x64xf32>, vector<64x256xf32>, vector<8x256xf32> -> vector<8x256xf32>
    %275 = arith.addf %273, %274 : vector<8x256xf32>
    %276 = arith.negf %275 : vector<8x256xf32>
    %277 = math.exp %276 : vector<8x256xf32>
    %cst_117 = arith.constant 1.000000e+00 : f32
    %278 = vector.broadcast %cst_117 : f32 to vector<8x256xf32>
    %279 = arith.addf %278, %277 : vector<8x256xf32>
    %280 = arith.divf %278, %279 : vector<8x256xf32>
    %281 = vector.extract_strided_slice %275 {offsets = [0, 128], sizes = [8, 64], strides = [1, 1]} : vector<8x256xf32> to vector<8x64xf32>
    %282 = math.tanh %281 : vector<8x64xf32>
    %283 = vector.extract_strided_slice %280 {offsets = [0, 0], sizes = [8, 64], strides = [1, 1]} : vector<8x256xf32> to vector<8x64xf32>
    %284 = vector.extract_strided_slice %280 {offsets = [0, 64], sizes = [8, 64], strides = [1, 1]} : vector<8x256xf32> to vector<8x64xf32>
    %285 = vector.extract_strided_slice %280 {offsets = [0, 192], sizes = [8, 64], strides = [1, 1]} : vector<8x256xf32> to vector<8x64xf32>
    %286 = arith.mulf %284, %268 : vector<8x64xf32>
    %287 = arith.mulf %283, %282 : vector<8x64xf32>
    %288 = arith.addf %286, %287 : vector<8x64xf32>
    %289 = math.tanh %288 : vector<8x64xf32>
    %290 = arith.mulf %285, %289 : vector<8x64xf32>
    %c24_118 = arith.constant 24 : index
    %c0_119 = arith.constant 0 : index
    %291 = vector.load %arg10[%c24_118, %c0_119] : memref<64x256xf32, #tpu.memory_space<vmem>>, vector<8x256xf32>
    %c32_120 = arith.constant 32 : index
    %c0_121 = arith.constant 0 : index
    %292 = vector.load %arg10[%c32_120, %c0_121] : memref<64x256xf32, #tpu.memory_space<vmem>>, vector<8x256xf32>
    %293 = arith.select %18, %291, %292 : vector<8x256xi1>, vector<8x256xf32>
    %cst_122 = arith.constant dense<0.000000e+00> : vector<8x256xf32>
    %294 = tpu.matmul %290, %228, %cst_122 {dimension_numbers = #tpu.dot_dimension_numbers<[1], [0], [0], [1], [0, 0, 1, 1], [], []>} : vector<8x64xf32>, vector<64x256xf32>, vector<8x256xf32> -> vector<8x256xf32>
    %295 = arith.addf %293, %294 : vector<8x256xf32>
    %296 = arith.negf %295 : vector<8x256xf32>
    %297 = math.exp %296 : vector<8x256xf32>
    %cst_123 = arith.constant 1.000000e+00 : f32
    %298 = vector.broadcast %cst_123 : f32 to vector<8x256xf32>
    %299 = arith.addf %298, %297 : vector<8x256xf32>
    %300 = arith.divf %298, %299 : vector<8x256xf32>
    %301 = vector.extract_strided_slice %295 {offsets = [0, 128], sizes = [8, 64], strides = [1, 1]} : vector<8x256xf32> to vector<8x64xf32>
    %302 = math.tanh %301 : vector<8x64xf32>
    %303 = vector.extract_strided_slice %300 {offsets = [0, 0], sizes = [8, 64], strides = [1, 1]} : vector<8x256xf32> to vector<8x64xf32>
    %304 = vector.extract_strided_slice %300 {offsets = [0, 64], sizes = [8, 64], strides = [1, 1]} : vector<8x256xf32> to vector<8x64xf32>
    %305 = vector.extract_strided_slice %300 {offsets = [0, 192], sizes = [8, 64], strides = [1, 1]} : vector<8x256xf32> to vector<8x64xf32>
    %306 = arith.mulf %304, %288 : vector<8x64xf32>
    %307 = arith.mulf %303, %302 : vector<8x64xf32>
    %308 = arith.addf %306, %307 : vector<8x64xf32>
    %309 = math.tanh %308 : vector<8x64xf32>
    %310 = arith.mulf %305, %309 : vector<8x64xf32>
    %c32_124 = arith.constant 32 : index
    %c0_125 = arith.constant 0 : index
    %311 = vector.load %arg10[%c32_124, %c0_125] : memref<64x256xf32, #tpu.memory_space<vmem>>, vector<8x256xf32>
    %c24_126 = arith.constant 24 : index
    %c0_127 = arith.constant 0 : index
    %312 = vector.load %arg10[%c24_126, %c0_127] : memref<64x256xf32, #tpu.memory_space<vmem>>, vector<8x256xf32>
    %313 = arith.select %18, %311, %312 : vector<8x256xi1>, vector<8x256xf32>
    %cst_128 = arith.constant dense<0.000000e+00> : vector<8x256xf32>
    %314 = tpu.matmul %310, %228, %cst_128 {dimension_numbers = #tpu.dot_dimension_numbers<[1], [0], [0], [1], [0, 0, 1, 1], [], []>} : vector<8x64xf32>, vector<64x256xf32>, vector<8x256xf32> -> vector<8x256xf32>
    %315 = arith.addf %313, %314 : vector<8x256xf32>
    %316 = arith.negf %315 : vector<8x256xf32>
    %317 = math.exp %316 : vector<8x256xf32>
    %cst_129 = arith.constant 1.000000e+00 : f32
    %318 = vector.broadcast %cst_129 : f32 to vector<8x256xf32>
    %319 = arith.addf %318, %317 : vector<8x256xf32>
    %320 = arith.divf %318, %319 : vector<8x256xf32>
    %321 = vector.extract_strided_slice %315 {offsets = [0, 128], sizes = [8, 64], strides = [1, 1]} : vector<8x256xf32> to vector<8x64xf32>
    %322 = math.tanh %321 : vector<8x64xf32>
    %323 = vector.extract_strided_slice %320 {offsets = [0, 0], sizes = [8, 64], strides = [1, 1]} : vector<8x256xf32> to vector<8x64xf32>
    %324 = vector.extract_strided_slice %320 {offsets = [0, 64], sizes = [8, 64], strides = [1, 1]} : vector<8x256xf32> to vector<8x64xf32>
    %325 = vector.extract_strided_slice %320 {offsets = [0, 192], sizes = [8, 64], strides = [1, 1]} : vector<8x256xf32> to vector<8x64xf32>
    %326 = arith.mulf %324, %308 : vector<8x64xf32>
    %327 = arith.mulf %323, %322 : vector<8x64xf32>
    %328 = arith.addf %326, %327 : vector<8x64xf32>
    %329 = math.tanh %328 : vector<8x64xf32>
    %330 = arith.mulf %325, %329 : vector<8x64xf32>
    %c40_130 = arith.constant 40 : index
    %c0_131 = arith.constant 0 : index
    %331 = vector.load %arg10[%c40_130, %c0_131] : memref<64x256xf32, #tpu.memory_space<vmem>>, vector<8x256xf32>
    %c16_132 = arith.constant 16 : index
    %c0_133 = arith.constant 0 : index
    %332 = vector.load %arg10[%c16_132, %c0_133] : memref<64x256xf32, #tpu.memory_space<vmem>>, vector<8x256xf32>
    %333 = arith.select %18, %331, %332 : vector<8x256xi1>, vector<8x256xf32>
    %cst_134 = arith.constant dense<0.000000e+00> : vector<8x256xf32>
    %334 = tpu.matmul %330, %228, %cst_134 {dimension_numbers = #tpu.dot_dimension_numbers<[1], [0], [0], [1], [0, 0, 1, 1], [], []>} : vector<8x64xf32>, vector<64x256xf32>, vector<8x256xf32> -> vector<8x256xf32>
    %335 = arith.addf %333, %334 : vector<8x256xf32>
    %336 = arith.negf %335 : vector<8x256xf32>
    %337 = math.exp %336 : vector<8x256xf32>
    %cst_135 = arith.constant 1.000000e+00 : f32
    %338 = vector.broadcast %cst_135 : f32 to vector<8x256xf32>
    %339 = arith.addf %338, %337 : vector<8x256xf32>
    %340 = arith.divf %338, %339 : vector<8x256xf32>
    %341 = vector.extract_strided_slice %335 {offsets = [0, 128], sizes = [8, 64], strides = [1, 1]} : vector<8x256xf32> to vector<8x64xf32>
    %342 = math.tanh %341 : vector<8x64xf32>
    %343 = vector.extract_strided_slice %340 {offsets = [0, 0], sizes = [8, 64], strides = [1, 1]} : vector<8x256xf32> to vector<8x64xf32>
    %344 = vector.extract_strided_slice %340 {offsets = [0, 64], sizes = [8, 64], strides = [1, 1]} : vector<8x256xf32> to vector<8x64xf32>
    %345 = vector.extract_strided_slice %340 {offsets = [0, 192], sizes = [8, 64], strides = [1, 1]} : vector<8x256xf32> to vector<8x64xf32>
    %346 = arith.mulf %344, %328 : vector<8x64xf32>
    %347 = arith.mulf %343, %342 : vector<8x64xf32>
    %348 = arith.addf %346, %347 : vector<8x64xf32>
    %349 = math.tanh %348 : vector<8x64xf32>
    %350 = arith.mulf %345, %349 : vector<8x64xf32>
    %c48_136 = arith.constant 48 : index
    %c0_137 = arith.constant 0 : index
    %351 = vector.load %arg10[%c48_136, %c0_137] : memref<64x256xf32, #tpu.memory_space<vmem>>, vector<8x256xf32>
    %c8_138 = arith.constant 8 : index
    %c0_139 = arith.constant 0 : index
    %352 = vector.load %arg10[%c8_138, %c0_139] : memref<64x256xf32, #tpu.memory_space<vmem>>, vector<8x256xf32>
    %353 = arith.select %18, %351, %352 : vector<8x256xi1>, vector<8x256xf32>
    %cst_140 = arith.constant dense<0.000000e+00> : vector<8x256xf32>
    %354 = tpu.matmul %350, %228, %cst_140 {dimension_numbers = #tpu.dot_dimension_numbers<[1], [0], [0], [1], [0, 0, 1, 1], [], []>} : vector<8x64xf32>, vector<64x256xf32>, vector<8x256xf32> -> vector<8x256xf32>
    %355 = arith.addf %353, %354 : vector<8x256xf32>
    %356 = arith.negf %355 : vector<8x256xf32>
    %357 = math.exp %356 : vector<8x256xf32>
    %cst_141 = arith.constant 1.000000e+00 : f32
    %358 = vector.broadcast %cst_141 : f32 to vector<8x256xf32>
    %359 = arith.addf %358, %357 : vector<8x256xf32>
    %360 = arith.divf %358, %359 : vector<8x256xf32>
    %361 = vector.extract_strided_slice %355 {offsets = [0, 128], sizes = [8, 64], strides = [1, 1]} : vector<8x256xf32> to vector<8x64xf32>
    %362 = math.tanh %361 : vector<8x64xf32>
    %363 = vector.extract_strided_slice %360 {offsets = [0, 0], sizes = [8, 64], strides = [1, 1]} : vector<8x256xf32> to vector<8x64xf32>
    %364 = vector.extract_strided_slice %360 {offsets = [0, 64], sizes = [8, 64], strides = [1, 1]} : vector<8x256xf32> to vector<8x64xf32>
    %365 = vector.extract_strided_slice %360 {offsets = [0, 192], sizes = [8, 64], strides = [1, 1]} : vector<8x256xf32> to vector<8x64xf32>
    %366 = arith.mulf %364, %348 : vector<8x64xf32>
    %367 = arith.mulf %363, %362 : vector<8x64xf32>
    %368 = arith.addf %366, %367 : vector<8x64xf32>
    %369 = math.tanh %368 : vector<8x64xf32>
    %370 = arith.mulf %365, %369 : vector<8x64xf32>
    %c56_142 = arith.constant 56 : index
    %c0_143 = arith.constant 0 : index
    %371 = vector.load %arg10[%c56_142, %c0_143] : memref<64x256xf32, #tpu.memory_space<vmem>>, vector<8x256xf32>
    %c0_144 = arith.constant 0 : index
    %c0_145 = arith.constant 0 : index
    %372 = vector.load %arg10[%c0_144, %c0_145] : memref<64x256xf32, #tpu.memory_space<vmem>>, vector<8x256xf32>
    %373 = arith.select %18, %371, %372 : vector<8x256xi1>, vector<8x256xf32>
    %cst_146 = arith.constant dense<0.000000e+00> : vector<8x256xf32>
    %374 = tpu.matmul %370, %228, %cst_146 {dimension_numbers = #tpu.dot_dimension_numbers<[1], [0], [0], [1], [0, 0, 1, 1], [], []>} : vector<8x64xf32>, vector<64x256xf32>, vector<8x256xf32> -> vector<8x256xf32>
    %375 = arith.addf %373, %374 : vector<8x256xf32>
    %376 = arith.negf %375 : vector<8x256xf32>
    %377 = math.exp %376 : vector<8x256xf32>
    %cst_147 = arith.constant 1.000000e+00 : f32
    %378 = vector.broadcast %cst_147 : f32 to vector<8x256xf32>
    %379 = arith.addf %378, %377 : vector<8x256xf32>
    %380 = arith.divf %378, %379 : vector<8x256xf32>
    %381 = vector.extract_strided_slice %375 {offsets = [0, 128], sizes = [8, 64], strides = [1, 1]} : vector<8x256xf32> to vector<8x64xf32>
    %382 = math.tanh %381 : vector<8x64xf32>
    %383 = vector.extract_strided_slice %380 {offsets = [0, 0], sizes = [8, 64], strides = [1, 1]} : vector<8x256xf32> to vector<8x64xf32>
    %384 = vector.extract_strided_slice %380 {offsets = [0, 64], sizes = [8, 64], strides = [1, 1]} : vector<8x256xf32> to vector<8x64xf32>
    %385 = vector.extract_strided_slice %380 {offsets = [0, 192], sizes = [8, 64], strides = [1, 1]} : vector<8x256xf32> to vector<8x64xf32>
    %386 = arith.mulf %384, %368 : vector<8x64xf32>
    %387 = arith.mulf %383, %382 : vector<8x64xf32>
    %388 = arith.addf %386, %387 : vector<8x64xf32>
    %389 = math.tanh %388 : vector<8x64xf32>
    %390 = arith.mulf %385, %389 : vector<8x64xf32>
    %c0_148 = arith.constant 0 : index
    %c0_149 = arith.constant 0 : index
    %391 = vector.load %arg7[%c0_148, %c0_149] : memref<64x8xf32, #tpu.memory_space<vmem>>, vector<64x8xf32>
    %cst_150 = arith.constant dense<0.000000e+00> : vector<8x8xf32>
    %392 = tpu.matmul %390, %391, %cst_150 {dimension_numbers = #tpu.dot_dimension_numbers<[1], [0], [0], [1], [0, 0, 1, 1], [], []>} : vector<8x64xf32>, vector<64x8xf32>, vector<8x8xf32> -> vector<8x8xf32>
    %c0_151 = arith.constant 0 : index
    %c0_152 = arith.constant 0 : index
    %393 = vector.load %arg8[%c0_151, %c0_152] : memref<1x8xf32, #tpu.memory_space<vmem>>, vector<1x8xf32>
    %394 = vector.broadcast %393 : vector<1x8xf32> to vector<8x8xf32>
    %395 = arith.addf %392, %394 : vector<8x8xf32>
    %c0_153 = arith.constant 0 : index
    %c0_154 = arith.constant 0 : index
    %396 = vector.load %arg9[%c0_153, %c0_154] : memref<8x8xf32, #tpu.memory_space<vmem>>, vector<8x8xf32>
    tpu.vector_store %arg9[%c0_153, %c0_154], %395 {strides = array<i32>} : memref<8x8xf32, #tpu.memory_space<vmem>>, vector<8x8xf32>,
    return
  }
}

</mosaic_0001>

<bundles_post_ra>
// kernel: simple_lstm_forward.1
= control target key start
LH: loop header
LB: loop body
LE: loop exit
PB: predicated region body
PF: predicated region fallthrough
CT: control target
= control target key end

     0   :  { %v2557_v3 = vmov 0.0   ;;  %vm97_vm0 = vcmask 523264   ;;  %v32_v41 = vlaneseq  ;;  %vm375_vm3 = vcmask 261120   ;;  %s3646_s1 = inlined_call_operand.vmem [shape: f32[64,256], index: 1, kind: input, shape index: {}]   ;;  %s3647_s2 = inlined_call_operand.vmem [shape: f32[64,256], index: 2, kind: input, shape index: {}]   ;;  %s3648_s0 = inlined_call_operand.vmem [shape: f32[64,64], index: 0, kind: input, shape index: {}]   ;;  %s3649_s3 = inlined_call_operand.vmem [shape: f32[1,256], index: 3, kind: input, shape index: {}]   ;;  %s3650_s4 = inlined_call_operand.vmem [shape: f32[64,256], index: 4, kind: input, shape index: {}]   ;;  %s3651_s5 = inlined_call_operand.vmem [shape: f32[64,256], index: 5, kind: input, shape index: {}]   ;;  %s3652_s6 = inlined_call_operand.vmem [shape: f32[1,256], index: 6, kind: input, shape index: {}]   ;;  %s3653_s7 = inlined_call_operand.vmem [shape: f32[64,8], index: 7, kind: input, shape index: {}]   ;;  %s3654_s8 = inlined_call_operand.vmem [shape: f32[1,8], index: 8, kind: input, shape index: {}]   ;;  %s3655_s9 = inlined_call_operand.vmem [shape: f32[8,8], index: 9, kind: output, shape index: {}]  }
   0x1   :  { %v84_v0 = vld [vmem:[%s3646_s1 + $0x78] sm:$0xff]  ;;  %v83_v1 = vld [vmem:[%s3646_s1 + $0x70] sm:$0xff]  ;;  %v82_v2 = vld [vmem:[%s3646_s1 + $0x68] sm:$0xff]  ;;  %186 = vmatprep.mubr.f32.mxu0 %v2557_v3  ;;  %340 = vmatprep.mubr.f32.mxu1 %v2557_v3  ;;  %vm377_vm4 = vcmask 523520   ;;  %vm2559_vm5 = vmmov 0   ;;  %vm2264_vm6 = vcmask 64512  }
   0x2   :  { %138 = vmatprep.subr.mxu0 %v84_v0  ;;  %v81_v4 = vld [vmem:[%s3646_s1 + $0x60] sm:$0xff]  ;;  %v80_v5 = vld [vmem:[%s3646_s1 + $0x58] sm:$0xff]  ;;  %v79_v6 = vld [vmem:[%s3646_s1 + $0x50] sm:$0xff]  ;;  %v2832_v42 = vshrl.u32 %v32_v41, 7  ;;  %v33_v52 = vand.u32 127, %v32_v41 }
   0x3   :  { %139 = vmatpush1.msra.mxu0 %v83_v1  ;;  %v78_v7 = vld [vmem:[%s3646_s1 + $0x48] sm:$0xff]  ;;  %v77_v8 = vld [vmem:[%s3646_s1 + $0x40] sm:$0xff]  ;;  %v76_v9 = vld [vmem:[%s3646_s1 + $0x38] sm:$0xff] }
   0x4   :  { %140 = vmatprep.subr.mxu0 %v82_v2  ;;  %v2642_v10 = vld [vmem:[%s3647_s2 + $0x78] sm:$0xff]  ;;  %v75_v11 = vld [vmem:[%s3646_s1 + $0x30] sm:$0xff]  ;;  %v2656_v13 = vld [vmem:[%s3647_s2 + $0x68] sm:$0xff]  ;;  %v3657_v43 = vsub.s32 0, %v2832_v42  ;;  %v3656_v46 = vsub.s32 1, %v2832_v42  ;;  %v34_v57 = vadd.s32 128, %v33_v52 }
   0x5   :  { %141 = vmatpush1.msra.mxu0 %v81_v4  ;;  %292 = vmatprep.subr.mxu1 %v2642_v10  ;;  %v2651_v12 = vld [vmem:[%s3647_s2 + $0x70] sm:$0xff]  ;;  %v74_v14 = vld [vmem:[%s3646_s1 + $0x28] sm:$0xff]  ;;  %v2665_v15 = vld [vmem:[%s3647_s2 + $0x60] sm:$0xff]  ;;  %v39_v60 = vand.u32 63, %v33_v52 }
   0x6   :  { %142 = vmatprep.subr.mxu0 %v80_v5  ;;  %293 = vmatpush1.msra.mxu1 %v2651_v12  ;;  %v2670_v16 = vld [vmem:[%s3647_s2 + $0x58] sm:$0xff]  ;;  %v73_v17 = vld [vmem:[%s3646_s1 + $0x20] sm:$0xff]  ;;  %v2679_v18 = vld [vmem:[%s3647_s2 + $0x50] sm:$0xff]  ;;  %v46_v63 = vand.u32 63, %v34_v57 }
   0x7   :  { %143 = vmatpush1.msra.mxu0 %v79_v6  ;;  %294 = vmatprep.subr.mxu1 %v2656_v13  ;;  %v72_v19 = vld [vmem:[%s3646_s1 + $0x18] sm:$0xff]  ;;  %v2688_v20 = vld [vmem:[%s3647_s2 + $0x48] sm:$0xff]  ;;  %v71_v21 = vld [vmem:[%s3646_s1 + $0x10] sm:$0xff]  ;;  %vm2855_vm1 = vcmp.lt.s32.totalorder %v39_v60, 32 }
   0x8   :  { %144 = vmatprep.subr.mxu0 %v78_v7  ;;  %295 = vmatpush1.msra.mxu1 %v2665_v15  ;;  %v2697_v22 = vld [vmem:[%s3647_s2 + $0x40] sm:$0xff]  ;;  %v70_v23 = vld [vmem:[%s3646_s1 + $0x8] sm:$0xff]  ;;  %v2706_v24 = vld [vmem:[%s3647_s2 + $0x38] sm:$0xff]  ;;  %vm2861_vm2 = vcmp.lt.s32.totalorder %v46_v63, 32 }
   0x9   :  { %145 = vmatpush1.msra.mxu0 %v77_v8  ;;  %296 = vmatprep.subr.mxu1 %v2670_v16  ;;  %v69_v25 = vld [vmem:[%s3646_s1] sm:$0xff]  ;;  %v2715_v26 = vld [vmem:[%s3647_s2 + $0x30] sm:$0xff]  ;;  %v2724_v28 = vld [vmem:[%s3647_s2 + $0x28] sm:$0xff] }
   0xa   :  { %146 = vmatprep.subr.mxu0 %v76_v9  ;;  %297 = vmatpush1.msra.mxu1 %v2679_v18  ;;  %v61_v27 = vld [vmem:[%s3648_s0] sm:$0xff]  ;;  %v2736_v30 = vld [vmem:[%s3647_s2 + $0x18] sm:$0xff]  ;;  %v2743_v31 = vld [vmem:[%s3647_s2 + $0x10] sm:$0xff] }
   0xb   :  { %147 = vmatpush1.msra.mxu0 %v75_v11  ;;  %298 = vmatprep.subr.mxu1 %v2688_v20  ;;  %v2730_v29 = vld [vmem:[%s3647_s2 + $0x20] sm:$0xff]  ;;  %v62_v32 = vld [vmem:[%s3648_s0 + $0x8] sm:$0xff]  ;;  %v63_v35 = vld [vmem:[%s3648_s0 + $0x10] sm:$0xff] }
   0xc   :  { %148 = vmatprep.subr.mxu0 %v74_v14  ;;  %299 = vmatpush1.msra.mxu1 %v2697_v22  ;;  %v2753_v33 = vld [vmem:[%s3647_s2 + $0x8] sm:$0xff]  ;;  %v2759_v34 = vld [vmem:[%s3647_s2] sm:$0xff]  ;;  %v64_v36 = vld [vmem:[%s3648_s0 + $0x18] sm:$0xff] }
   0xd   :  { %149 = vmatpush1.msra.mxu0 %v73_v17  ;;  %300 = vmatprep.subr.mxu1 %v2706_v24  ;;  %v65_v37 = vld [vmem:[%s3648_s0 + $0x20] sm:$0xff]  ;;  %v66_v38 = vld [vmem:[%s3648_s0 + $0x28] sm:$0xff]  ;;  %v67_v39 = vld [vmem:[%s3648_s0 + $0x30] sm:$0xff] }
   0xe   :  { %150 = vmatprep.subr.mxu0 %v72_v19  ;;  %301 = vmatpush1.msra.mxu1 %v2715_v26  ;;  %v68_v40 = vld [vmem:[%s3648_s0 + $0x38] sm:$0xff]  ;;  %v85_v44 = vld [vmem:[%s3649_s3] sm:$0x3]  ;;  %s2558_s3 = smov 64   ;;  %v2180_v6 = vld [vmem:[%s3653_s7 + $0x30] sm:$0xff] }
   0xf   :  { %151 = vmatpush1.msra.mxu0 %v71_v21  ;;  %302 = vmatprep.subr.mxu1 %v2724_v28  ;;  %v90_v48 = vrot.slane %v85_v44, %v3657_v43  ;;  %v94_v50 = vrot.slane %v85_v44, %v3656_v46 }
  0x10   :  { %152 = vmatprep.subr.mxu0 %v70_v23  ;;  %303 = vmatpush1.msra.mxu1 %v2730_v29 }
  0x11   :  { %153 = vmatpush1.msra.mxu0 %v69_v25  ;;  %304 = vmatprep.subr.mxu1 %v2736_v30 }
  0x12   :  { %2270 = vmatmul.mubr.msk.f32.vlgmr.msra.gmra.mxu0 %vm97_vm0, %v61_v27  ;;  %512 = vmatprep.subr.mxu0 %v2642_v10 }
  0x13   :  { %192 = vmatprep.mubr.f32.mxu0 %v2557_v3  ;;  %305 = vmatpush1.msra.mxu1 %v2743_v31 }
  0x14   :  { %513 = vmatpush1.msra.mxu0 %v2651_v12  ;;  %306 = vmatprep.subr.mxu1 %v2753_v33 }
  0x15   :  { %307 = vmatpush1.msra.mxu1 %v2759_v34  ;;  %514 = vmatprep.subr.mxu0 %v2656_v13 }
  0x16   :  { %2271 = vmatmul.mubr.msk.f32.gmra.mxu0 %vm97_vm0, %v62_v32  ;;  %341 = vmatmul.mubr.f32.vlgmr.msra.gmra.mxu1 %v2557_v3 }
  0x17   :  { %198 = vmatprep.mubr.f32.mxu0 %v2557_v3  ;;  %403 = vmatprep.subr.mxu1 %v2642_v10 }
  0x18   :  { %404 = vmatpush1.msra.mxu1 %v2651_v12  ;;  %451 = vmatprep.mubr.f32.mxu1 %v2557_v3 }
  0x19   :  { %405 = vmatprep.subr.mxu1 %v2656_v13  ;;  %515 = vmatpush1.msra.mxu0 %v2665_v15 }
  0x1a   :  { %2272 = vmatmul.mubr.msk.f32.gmra.mxu0 %vm97_vm0, %v63_v35  ;;  %406 = vmatpush1.msra.mxu1 %v2665_v15 }
  0x1b   :  { %204 = vmatprep.mubr.f32.mxu0 %v2557_v3  ;;  %407 = vmatprep.subr.mxu1 %v2670_v16 }
  0x1c   :  { %408 = vmatpush1.msra.mxu1 %v2679_v18  ;;  %516 = vmatprep.subr.mxu0 %v2670_v16 }
  0x1d   :  { %409 = vmatprep.subr.mxu1 %v2688_v20  ;;  %517 = vmatpush1.msra.mxu0 %v2679_v18 }
  0x1e   :  { %2273 = vmatmul.mubr.msk.f32.gmra.mxu0 %vm97_vm0, %v64_v36  ;;  %410 = vmatpush1.msra.mxu1 %v2697_v22 }
  0x1f   :  { %210 = vmatprep.mubr.f32.mxu0 %v2557_v3  ;;  %411 = vmatprep.subr.mxu1 %v2706_v24 }
  0x20   :  { %412 = vmatpush1.msra.mxu1 %v2715_v26  ;;  %518 = vmatprep.subr.mxu0 %v2688_v20 }
  0x21   :  { %413 = vmatprep.subr.mxu1 %v2724_v28  ;;  %519 = vmatpush1.msra.mxu0 %v2697_v22 }
  0x22   :  { %2274 = vmatmul.mubr.msk.f32.gmra.mxu0 %vm97_vm0, %v65_v37  ;;  %414 = vmatpush1.msra.mxu1 %v2730_v29 }
  0x23   :  { %216 = vmatprep.mubr.f32.mxu0 %v2557_v3  ;;  %415 = vmatprep.subr.mxu1 %v2736_v30 }
  0x24   :  { %416 = vmatpush1.msra.mxu1 %v2743_v31  ;;  %520 = vmatprep.subr.mxu0 %v2706_v24 }
  0x25   :  { %417 = vmatprep.subr.mxu1 %v2753_v33  ;;  %521 = vmatpush1.msra.mxu0 %v2715_v26 }
  0x26   :  { %2275 = vmatmul.mubr.msk.f32.gmra.mxu0 %vm97_vm0, %v66_v38  ;;  %418 = vmatpush1.msra.mxu1 %v2759_v34 }
  0x27   :  { %222 = vmatprep.mubr.f32.mxu0 %v2557_v3  ;;  %621 = vmatprep.subr.mxu1 %v2642_v10 }
  0x28   :  { %522 = vmatprep.subr.mxu0 %v2724_v28 }
  0x29   :  { %523 = vmatpush1.msra.mxu0 %v2730_v29 }
  0x2a   :  { %2276 = vmatmul.mubr.msk.f32.gmra.mxu0 %vm97_vm0, %v67_v39  ;;  %524 = vmatprep.subr.mxu0 %v2736_v30 }
  0x2b   :  { %228 = vmatprep.mubr.f32.mxu0 %v2557_v3  ;;  %525 = vmatpush1.msra.mxu0 %v2743_v31 }
  0x2c   :  { %526 = vmatprep.subr.mxu0 %v2753_v33 }
  0x2d   :  { %527 = vmatpush1.msra.mxu0 %v2759_v34 }
  0x2e   :  { %2277 = vmatmul.mubr.msk.f32.gmra.mxu0 %vm97_vm0, %v68_v40  ;;  %730 = vmatprep.subr.mxu0 %v2642_v10 }
  0x2f   :  { %560 = vmatprep.mubr.f32.mxu0 %v2557_v3 }
  0xd2   :  { %v188_v45 = vpop.f32.mrf.mxu0 }
  0xd3   :  { %v2915_v52 = vadd.f32 %v188_v45, %v90_v48 }
  0xd4   :  { %v190_v47 = vpop.f32.mrf.mxu0 }
  0xd5   :  { %v2927_v60 = vadd.f32 %v190_v47, %v94_v50 }
  0xd6   :  { %v194_v49 = vpop.f32.mrf.mxu0 }
  0xd7   :  { %v2843_v51 = vadd.f32 %v194_v49, %v90_v48 }
  0xd8   :  { %v196_v53 = vpop.f32.mrf.mxu0 }
  0xd9   :  { %v2845_v54 = vadd.f32 %v196_v53, %v94_v50 }
  0xda   :  { %v200_v55 = vpop.f32.mrf.mxu0 }
  0xdb   :  { %v2847_v56 = vadd.f32 %v200_v55, %v90_v48 }
  0xdc   :  { %v202_v58 = vpop.f32.mrf.mxu0 }
  0xdd   :  { %v2849_v59 = vadd.f32 %v202_v58, %v94_v50 }
  0xde   :  { %v206_v61 = vpop.f32.mrf.mxu0 }
  0xdf   :  { %v2851_v62 = vadd.f32 %v206_v61, %v90_v48 }
  0xe0   :  { %v208_v0 = vpop.f32.mrf.mxu0 }
  0xe1   :  { %v2853_v1 = vadd.f32 %v208_v0, %v94_v50 }
  0xe2   :  { %v212_v4 = vpop.f32.mrf.mxu0 }
  0xe3   :  { %v2859_v5 = vadd.f32 %v212_v4, %v90_v48 }
  0xe4   :  { %v214_v7 = vpop.f32.mrf.mxu0 }
  0xe5   :  { %v2865_v8 = vadd.f32 %v214_v7, %v94_v50  ;;  %v601_v9 = vsel %vm2855_vm1, %v2851_v62, %v2859_v5  ;;  %v710_v11 = vsel %vm2855_vm1, %v2859_v5, %v2851_v62 }
  0xe6   :  { %v218_v14 = vpop.f32.mrf.mxu0 }
  0xe7   :  { %v2875_v17 = vadd.f32 %v218_v14, %v90_v48  ;;  %v602_v19 = vsel %vm2861_vm2, %v2853_v1, %v2865_v8  ;;  %v711_v21 = vsel %vm2861_vm2, %v2865_v8, %v2853_v1 }
  0xe8   :  { %v220_v23 = vpop.f32.mrf.mxu0 }
  0xe9   :  { %v2885_v25 = vadd.f32 %v220_v23, %v94_v50  ;;  %v492_v27 = vsel %vm2855_vm1, %v2847_v56, %v2875_v17  ;;  %v819_v32 = vsel %vm2855_vm1, %v2875_v17, %v2847_v56 }
  0xea   :  { %v224_v35 = vpop.f32.mrf.mxu0 }
  0xeb   :  { %v2895_v36 = vadd.f32 %v224_v35, %v90_v48  ;;  %v493_v37 = vsel %vm2861_vm2, %v2849_v59, %v2885_v25  ;;  %v820_v38 = vsel %vm2861_vm2, %v2885_v25, %v2849_v59 }
  0xec   :  { %v226_v39 = vpop.f32.mrf.mxu0 }
  0xed   :  { %v2905_v40 = vadd.f32 %v226_v39, %v94_v50  ;;  %v383_v41 = vsel %vm2855_vm1, %v2843_v51, %v2895_v36  ;;  %v928_v44 = vsel %vm2855_vm1, %v2895_v36, %v2843_v51 }
  0xee   :  { %v230_v49 = vpop.f32.mrf.mxu0 }
  0xef   :  { %v2917_v53 = vadd.f32 %v230_v49, %v90_v48  ;;  %v384_v55 = vsel %vm2861_vm2, %v2845_v54, %v2905_v40  ;;  %v929_v57 = vsel %vm2861_vm2, %v2905_v40, %v2845_v54  ;;  %v342_v48 = vpop.f32.mrf.mxu1 }
  0xf0   :  { %v232_v58 = vpop.f32.mrf.mxu0 }
  0xf1   :  { %v271_v45 = vsel %vm2855_vm1, %v2915_v52, %v2917_v53  ;;  %v2933_v61 = vadd.f32 %v232_v58, %v94_v50  ;;  %v1037_v63 = vsel %vm2855_vm1, %v2917_v53, %v2915_v52  ;;  %v344_v50 = vpop.f32.mrf.mxu1  ;;  %v1165_v52 = vld [vmem:[%s3650_s4 + $0x78] sm:$0xff]  ;;  %v1164_v53 = vld [vmem:[%s3650_s4 + $0x70] sm:$0xff] }
  0xf2   :  { %v347_v0 = vadd.f32 %v342_v48, %v271_v45 }
  0xf3   :  { %v1038_v47 = vsel %vm2861_vm2, %v2933_v61, %v2927_v60  ;;  %v272_v7 = vsel %vm2861_vm2, %v2927_v60, %v2933_v61  ;;  %v1163_v60 = vld [vmem:[%s3650_s4 + $0x68] sm:$0xff]  ;;  %v1162_v61 = vld [vmem:[%s3650_s4 + $0x60] sm:$0xff] }
  0xf4   :  { %v2278_v4 = vmul.f32 -1.442695, %v347_v0  ;;  %v348_v14 = vadd.f32 %v344_v50, %v272_v7 }
  0xf6   :  { %2365 = vpow2.f32 %v2278_v4  ;;  %v2279_v45 = vmul.f32 -1.442695, %v348_v14 }
  0xf7   :  { %2367 = vtanh.f32 %v348_v14 }
 0x103   :  { %v2366_v23 = vpop.eup %2365 }
 0x104   :  { %v355_v35 = vadd.f32 1.0, %v2366_v23  ;;  %v2368_v39 = vpop.eup %2367 }
 0x106   :  { %2369 = vrcp.f32 %v355_v35 }
 0x107   :  { %2371 = vpow2.f32 %v2279_v45 }
 0x113   :  { %v2370_v49 = vpop.eup %2369 }
 0x114   :  { %v363_v58 = vmul.f32 %v2370_v49, %v2368_v39  ;;  %v2372_v48 = vpop.eup %2371  ;;  %v362_v4 = vmul.f32 0.0, %v2370_v49 }
 0x115   :  { %v356_v0 = vadd.f32 1.0, %v2372_v48 }
 0x116   :  { %365 = vrot.lane.b32.xlu0 %v363_v58, %s2558_s3 }
 0x117   :  { %2373 = vrcp.f32 %v356_v0 }
 0x124   :  { %v2374_v7 = vpop.eup %2373 }
 0x188   :  { %v366_v46 = vpop.permute.xlu0 %365 }
 0x189   :  { %v368_v43 = vadd.f32 %v366_v46, %v362_v4 }
 0x18b   :  { %2375 = vtanh.f32 %v368_v43 }
 0x198   :  { %v2376_v50 = vpop.eup %2375 }
 0x199   :  { %v370_v23 = vmul.f32 %v2376_v50, %v2374_v7 }
 0x19b   :  { %372 = vrot.lane.b32.xlu0 %v370_v23, %s2558_s3 }
 0x20d   :  { %v373_v35 = vpop.permute.xlu0 %372 }
 0x20e   :  { %376 = vst.msk [vmem:[#allocation3] sm:$0xff] %vm375_vm3, %v373_v35  ;;  %2280 = vmatmul.mubr.msk.f32.vlgmr.msra.gmra.mxu1 %vm97_vm0, %v373_v35 }
 0x20f   :  { %378 = vst.msk [vmem:[#allocation3 + $0x38] sm:$0xff] %vm377_vm4, %v373_v35  ;;  %622 = vmatpush1.msra.mxu1 %v2651_v12  ;;  %669 = vmatprep.mubr.f32.mxu1 %v2557_v3 }
 0x210   :  { %623 = vmatprep.subr.mxu1 %v2656_v13 }
 0x211   :  { %624 = vmatpush1.msra.mxu1 %v2665_v15 }
 0x212   :  { %625 = vmatprep.subr.mxu1 %v2670_v16 }
 0x213   :  { %626 = vmatpush1.msra.mxu1 %v2679_v18 }
 0x214   :  { %627 = vmatprep.subr.mxu1 %v2688_v20 }
 0x215   :  { %628 = vmatpush1.msra.mxu1 %v2697_v22 }
 0x216   :  { %629 = vmatprep.subr.mxu1 %v2706_v24 }
 0x217   :  { %630 = vmatpush1.msra.mxu1 %v2715_v26 }
 0x218   :  { %631 = vmatprep.subr.mxu1 %v2724_v28 }
 0x219   :  { %632 = vmatpush1.msra.mxu1 %v2730_v29 }
 0x21a   :  { %633 = vmatprep.subr.mxu1 %v2736_v30 }
 0x21b   :  { %634 = vmatpush1.msra.mxu1 %v2743_v31 }
 0x21c   :  { %635 = vmatprep.subr.mxu1 %v2753_v33 }
 0x21d   :  { %636 = vmatpush1.msra.mxu1 %v2759_v34 }
 0x21e   :  { %839 = vmatprep.subr.mxu1 %v2642_v10 }
 0x2ce   :  { %v453_v46 = vpop.f32.mrf.mxu1 }
 0x2cf   :  { %v458_v14 = vadd.f32 %v453_v46, %v383_v41 }
 0x2d0   :  { %v455_v49 = vpop.f32.mrf.mxu1 }
 0x2d1   :  { %v2281_v39 = vmul.f32 -1.442695, %v458_v14  ;;  %v459_v58 = vadd.f32 %v455_v49, %v384_v55 }
 0x2d3   :  { %2377 = vpow2.f32 %v2281_v39  ;;  %v2282_v50 = vmul.f32 -1.442695, %v459_v58 }
 0x2d4   :  { %2379 = vtanh.f32 %v459_v58 }
 0x2e0   :  { %v2378_v45 = vpop.eup %2377 }
 0x2e1   :  { %v466_v48 = vadd.f32 1.0, %v2378_v45  ;;  %v2380_v0 = vpop.eup %2379 }
 0x2e3   :  { %2381 = vrcp.f32 %v466_v48 }
 0x2e4   :  { %2383 = vpow2.f32 %v2282_v50 }
 0x2f0   :  { %v2382_v4 = vpop.eup %2381 }
 0x2f1   :  { %v474_v7 = vmul.f32 %v2382_v4, %v2380_v0  ;;  %v2384_v41 = vpop.eup %2383  ;;  %v473_v35 = vmul.f32 %v2382_v4, %v368_v43 }
 0x2f2   :  { %v467_v23 = vadd.f32 1.0, %v2384_v41 }
 0x2f3   :  { %476 = vrot.lane.b32.xlu1 %v474_v7, %s2558_s3 }
 0x2f4   :  { %2385 = vrcp.f32 %v467_v23 }
 0x301   :  { %v2386_v39 = vpop.eup %2385 }
 0x365   :  { %v477_v46 = vpop.permute.xlu1 %476 }
 0x366   :  { %v479_v14 = vadd.f32 %v477_v46, %v473_v35 }
 0x368   :  { %2387 = vtanh.f32 %v479_v14 }
 0x375   :  { %v2388_v55 = vpop.eup %2387 }
 0x376   :  { %v481_v49 = vmul.f32 %v2388_v55, %v2386_v39 }
 0x378   :  { %483 = vrot.lane.b32.xlu1 %v481_v49, %s2558_s3 }
 0x3ea   :  { %v484_v45 = vpop.permute.xlu1 %483 }
 0x3eb   :  { %486 = vst.msk [vmem:[#allocation3 + $0x8] sm:$0xff] %vm375_vm3, %v484_v45  ;;  %2283 = vmatmul.mubr.msk.f32.vlgmr.msra.gmra.mxu0 %vm97_vm0, %v484_v45 }
 0x3ec   :  { %487 = vst.msk [vmem:[#allocation3 + $0x30] sm:$0xff] %vm377_vm4, %v484_v45  ;;  %731 = vmatpush1.msra.mxu0 %v2651_v12  ;;  %778 = vmatprep.mubr.f32.mxu0 %v2557_v3 }
 0x3ed   :  { %732 = vmatprep.subr.mxu0 %v2656_v13 }
 0x3ee   :  { %733 = vmatpush1.msra.mxu0 %v2665_v15 }
 0x3ef   :  { %734 = vmatprep.subr.mxu0 %v2670_v16 }
 0x3f0   :  { %735 = vmatpush1.msra.mxu0 %v2679_v18 }
 0x3f1   :  { %736 = vmatprep.subr.mxu0 %v2688_v20 }
 0x3f2   :  { %737 = vmatpush1.msra.mxu0 %v2697_v22 }
 0x3f3   :  { %738 = vmatprep.subr.mxu0 %v2706_v24 }
 0x3f4   :  { %739 = vmatpush1.msra.mxu0 %v2715_v26 }
 0x3f5   :  { %740 = vmatprep.subr.mxu0 %v2724_v28 }
 0x3f6   :  { %741 = vmatpush1.msra.mxu0 %v2730_v29 }
 0x3f7   :  { %742 = vmatprep.subr.mxu0 %v2736_v30 }
 0x3f8   :  { %743 = vmatpush1.msra.mxu0 %v2743_v31 }
 0x3f9   :  { %744 = vmatprep.subr.mxu0 %v2753_v33 }
 0x3fa   :  { %745 = vmatpush1.msra.mxu0 %v2759_v34 }
 0x3fb   :  { %948 = vmatprep.subr.mxu0 %v2642_v10 }
 0x4ab   :  { %v562_v43 = vpop.f32.mrf.mxu0 }
 0x4ac   :  { %v567_v58 = vadd.f32 %v562_v43, %v492_v27 }
 0x4ad   :  { %v564_v0 = vpop.f32.mrf.mxu0 }
 0x4ae   :  { %v2284_v48 = vmul.f32 -1.442695, %v567_v58  ;;  %v568_v4 = vadd.f32 %v564_v0, %v493_v37 }
 0x4b0   :  { %2389 = vpow2.f32 %v2284_v48  ;;  %v2285_v46 = vmul.f32 -1.442695, %v568_v4 }
 0x4b1   :  { %2391 = vtanh.f32 %v568_v4 }
 0x4bd   :  { %v2390_v7 = vpop.eup %2389 }
 0x4be   :  { %v575_v50 = vadd.f32 1.0, %v2390_v7  ;;  %v2392_v41 = vpop.eup %2391 }
 0x4c0   :  { %2393 = vrcp.f32 %v575_v50 }
 0x4c1   :  { %2395 = vpow2.f32 %v2285_v46 }
 0x4cd   :  { %v2394_v23 = vpop.eup %2393 }
 0x4ce   :  { %v583_v35 = vmul.f32 %v2394_v23, %v2392_v41  ;;  %v2396_v27 = vpop.eup %2395  ;;  %v582_v55 = vmul.f32 %v2394_v23, %v479_v14 }
 0x4cf   :  { %v576_v39 = vadd.f32 1.0, %v2396_v27 }
 0x4d0   :  { %585 = vrot.lane.b32.xlu0 %v583_v35, %s2558_s3 }
 0x4d1   :  { %2397 = vrcp.f32 %v576_v39 }
 0x4de   :  { %v2398_v43 = vpop.eup %2397 }
 0x542   :  { %v586_v49 = vpop.permute.xlu0 %585 }
 0x543   :  { %v588_v45 = vadd.f32 %v586_v49, %v582_v55 }
 0x545   :  { %2399 = vtanh.f32 %v588_v45 }
 0x552   :  { %v2400_v37 = vpop.eup %2399 }
 0x553   :  { %v590_v58 = vmul.f32 %v2400_v37, %v2398_v43 }
 0x555   :  { %592 = vrot.lane.b32.xlu1 %v590_v58, %s2558_s3 }
 0x5c7   :  { %v593_v48 = vpop.permute.xlu1 %592 }
 0x5c8   :  { %595 = vst.msk [vmem:[#allocation3 + $0x10] sm:$0xff] %vm375_vm3, %v593_v48  ;;  %2286 = vmatmul.mubr.msk.f32.vlgmr.msra.gmra.mxu1 %vm97_vm0, %v593_v48 }
 0x5c9   :  { %596 = vst.msk [vmem:[#allocation3 + $0x28] sm:$0xff] %vm377_vm4, %v593_v48  ;;  %840 = vmatpush1.msra.mxu1 %v2651_v12  ;;  %887 = vmatprep.mubr.f32.mxu1 %v2557_v3 }
 0x5ca   :  { %841 = vmatprep.subr.mxu1 %v2656_v13 }
 0x5cb   :  { %842 = vmatpush1.msra.mxu1 %v2665_v15 }
 0x5cc   :  { %843 = vmatprep.subr.mxu1 %v2670_v16 }
 0x5cd   :  { %844 = vmatpush1.msra.mxu1 %v2679_v18 }
 0x5ce   :  { %845 = vmatprep.subr.mxu1 %v2688_v20 }
 0x5cf   :  { %846 = vmatpush1.msra.mxu1 %v2697_v22 }
 0x5d0   :  { %847 = vmatprep.subr.mxu1 %v2706_v24 }
 0x5d1   :  { %848 = vmatpush1.msra.mxu1 %v2715_v26 }
 0x5d2   :  { %849 = vmatprep.subr.mxu1 %v2724_v28 }
 0x5d3   :  { %850 = vmatpush1.msra.mxu1 %v2730_v29 }
 0x5d4   :  { %851 = vmatprep.subr.mxu1 %v2736_v30 }
 0x5d5   :  { %852 = vmatpush1.msra.mxu1 %v2743_v31 }
 0x5d6   :  { %853 = vmatprep.subr.mxu1 %v2753_v33 }
 0x5d7   :  { %854 = vmatpush1.msra.mxu1 %v2759_v34 }
 0x5d8   :  { %1057 = vmatprep.subr.mxu1 %v2642_v10 }
 0x688   :  { %v671_v14 = vpop.f32.mrf.mxu1 }
 0x689   :  { %v676_v0 = vadd.f32 %v671_v14, %v601_v9 }
 0x68a   :  { %v673_v7 = vpop.f32.mrf.mxu1 }
 0x68b   :  { %v2287_v4 = vmul.f32 -1.442695, %v676_v0  ;;  %v677_v50 = vadd.f32 %v673_v7, %v602_v19 }
 0x68d   :  { %2401 = vpow2.f32 %v2287_v4  ;;  %v2288_v27 = vmul.f32 -1.442695, %v677_v50 }
 0x68e   :  { %2403 = vtanh.f32 %v677_v50 }
 0x69a   :  { %v2402_v41 = vpop.eup %2401 }
 0x69b   :  { %v684_v23 = vadd.f32 1.0, %v2402_v41  ;;  %v2404_v10 = vpop.eup %2403 }
 0x69d   :  { %2405 = vrcp.f32 %v684_v23 }
 0x69e   :  { %2407 = vpow2.f32 %v2288_v27 }
 0x6aa   :  { %v2406_v35 = vpop.eup %2405 }
 0x6ab   :  { %v692_v46 = vmul.f32 %v2406_v35, %v2404_v10  ;;  %v2408_v9 = vpop.eup %2407  ;;  %v691_v55 = vmul.f32 %v2406_v35, %v588_v45 }
 0x6ac   :  { %v685_v39 = vadd.f32 1.0, %v2408_v9 }
 0x6ad   :  { %694 = vrot.lane.b32.xlu0 %v692_v46, %s2558_s3 }
 0x6ae   :  { %2409 = vrcp.f32 %v685_v39 }
 0x6bb   :  { %v2410_v37 = vpop.eup %2409 }
 0x71f   :  { %v695_v49 = vpop.permute.xlu0 %694 }
 0x720   :  { %v697_v43 = vadd.f32 %v695_v49, %v691_v55 }
 0x722   :  { %2411 = vtanh.f32 %v697_v43 }
 0x72f   :  { %v2412_v19 = vpop.eup %2411 }
 0x730   :  { %v699_v58 = vmul.f32 %v2412_v19, %v2410_v37 }
 0x732   :  { %701 = vrot.lane.b32.xlu1 %v699_v58, %s2558_s3 }
 0x7a4   :  { %v702_v48 = vpop.permute.xlu1 %701 }
 0x7a5   :  { %704 = vst.msk [vmem:[#allocation3 + $0x18] sm:$0xff] %vm375_vm3, %v702_v48  ;;  %2289 = vmatmul.mubr.msk.f32.vlgmr.msra.gmra.mxu0 %vm97_vm0, %v702_v48 }
 0x7a6   :  { %705 = vst.msk [vmem:[#allocation3 + $0x20] sm:$0xff] %vm377_vm4, %v702_v48  ;;  %949 = vmatpush1.msra.mxu0 %v2651_v12  ;;  %996 = vmatprep.mubr.f32.mxu0 %v2557_v3 }
 0x7a7   :  { %950 = vmatprep.subr.mxu0 %v2656_v13 }
 0x7a8   :  { %951 = vmatpush1.msra.mxu0 %v2665_v15 }
 0x7a9   :  { %952 = vmatprep.subr.mxu0 %v2670_v16 }
 0x7aa   :  { %953 = vmatpush1.msra.mxu0 %v2679_v18 }
 0x7ab   :  { %954 = vmatprep.subr.mxu0 %v2688_v20 }
 0x7ac   :  { %955 = vmatpush1.msra.mxu0 %v2697_v22 }
 0x7ad   :  { %956 = vmatprep.subr.mxu0 %v2706_v24 }
 0x7ae   :  { %957 = vmatpush1.msra.mxu0 %v2715_v26 }
 0x7af   :  { %958 = vmatprep.subr.mxu0 %v2724_v28 }
 0x7b0   :  { %959 = vmatpush1.msra.mxu0 %v2730_v29 }
 0x7b1   :  { %960 = vmatprep.subr.mxu0 %v2736_v30 }
 0x7b2   :  { %961 = vmatpush1.msra.mxu0 %v2743_v31 }
 0x7b3   :  { %962 = vmatprep.subr.mxu0 %v2753_v33 }
 0x7b4   :  { %963 = vmatpush1.msra.mxu0 %v2759_v34 }
 0x7b5   :  { %1218 = vmatprep.subr.mxu0 %v1165_v52 }
 0x865   :  { %v780_v45 = vpop.f32.mrf.mxu0 }
 0x866   :  { %v785_v14 = vadd.f32 %v780_v45, %v710_v11 }
 0x867   :  { %v782_v4 = vpop.f32.mrf.mxu0 }
 0x868   :  { %v2290_v0 = vmul.f32 -1.442695, %v785_v14  ;;  %v786_v7 = vadd.f32 %v782_v4, %v711_v21 }
 0x86a   :  { %2413 = vpow2.f32 %v2290_v0  ;;  %v2291_v62 = vmul.f32 -1.442695, %v786_v7 }
 0x86b   :  { %2415 = vtanh.f32 %v786_v7 }
 0x877   :  { %v2414_v50 = vpop.eup %2413 }
 0x878   :  { %v793_v41 = vadd.f32 1.0, %v2414_v50  ;;  %v2416_v23 = vpop.eup %2415 }
 0x87a   :  { %2417 = vrcp.f32 %v793_v41 }
 0x87b   :  { %2419 = vpow2.f32 %v2291_v62 }
 0x887   :  { %v2418_v10 = vpop.eup %2417 }
 0x888   :  { %v801_v35 = vmul.f32 %v2418_v10, %v2416_v23  ;;  %v2420_v5 = vpop.eup %2419  ;;  %v800_v46 = vmul.f32 %v2418_v10, %v697_v43 }
 0x889   :  { %v794_v11 = vadd.f32 1.0, %v2420_v5 }
 0x88a   :  { %803 = vrot.lane.b32.xlu0 %v801_v35, %s2558_s3 }
 0x88b   :  { %2421 = vrcp.f32 %v794_v11 }
 0x898   :  { %v2422_v1 = vpop.eup %2421 }
 0x8fc   :  { %v804_v27 = vpop.permute.xlu0 %803 }
 0x8fd   :  { %v806_v9 = vadd.f32 %v804_v27, %v800_v46 }
 0x8ff   :  { %2423 = vtanh.f32 %v806_v9 }
 0x90c   :  { %v2424_v8 = vpop.eup %2423 }
 0x90d   :  { %v808_v21 = vmul.f32 %v2424_v8, %v2422_v1  ;;  %v1159_v1 = vld [vmem:[%s3650_s4 + $0x48] sm:$0xff]  ;;  %v1158_v8 = vld [vmem:[%s3650_s4 + $0x40] sm:$0xff] }
 0x90f   :  { %810 = vrot.lane.b32.xlu1 %v808_v21, %s2558_s3 }
 0x981   :  { %v811_v39 = vpop.permute.xlu1 %810 }
 0x982   :  { %813 = vst.msk [vmem:[#allocation3 + $0x20] sm:$0xff] %vm375_vm3, %v811_v39  ;;  %2292 = vmatmul.mubr.msk.f32.vlgmr.msra.gmra.mxu1 %vm97_vm0, %v811_v39 }
 0x983   :  { %814 = vst.msk [vmem:[#allocation3 + $0x18] sm:$0xff] %vm377_vm4, %v811_v39  ;;  %1058 = vmatpush1.msra.mxu1 %v2651_v12  ;;  %1105 = vmatprep.mubr.f32.mxu1 %v2557_v3 }
 0x984   :  { %1059 = vmatprep.subr.mxu1 %v2656_v13 }
 0x985   :  { %1060 = vmatpush1.msra.mxu1 %v2665_v15 }
 0x986   :  { %1061 = vmatprep.subr.mxu1 %v2670_v16 }
 0x987   :  { %1062 = vmatpush1.msra.mxu1 %v2679_v18 }
 0x988   :  { %1063 = vmatprep.subr.mxu1 %v2688_v20 }
 0x989   :  { %1064 = vmatpush1.msra.mxu1 %v2697_v22 }
 0x98a   :  { %1065 = vmatprep.subr.mxu1 %v2706_v24 }
 0x98b   :  { %1066 = vmatpush1.msra.mxu1 %v2715_v26 }
 0x98c   :  { %1067 = vmatprep.subr.mxu1 %v2724_v28 }
 0x98d   :  { %1068 = vmatpush1.msra.mxu1 %v2730_v29 }
 0x98e   :  { %1069 = vmatprep.subr.mxu1 %v2736_v30 }
 0x98f   :  { %1070 = vmatpush1.msra.mxu1 %v2743_v31 }
 0x990   :  { %1071 = vmatprep.subr.mxu1 %v2753_v33 }
 0x991   :  { %1072 = vmatpush1.msra.mxu1 %v2759_v34 }
 0xa42   :  { %v889_v12 = vpop.f32.mrf.mxu1 }
 0xa43   :  { %v894_v13 = vadd.f32 %v889_v12, %v819_v32 }
 0xa44   :  { %v891_v16 = vpop.f32.mrf.mxu1 }
 0xa45   :  { %v2293_v15 = vmul.f32 -1.442695, %v894_v13  ;;  %v895_v18 = vadd.f32 %v891_v16, %v820_v38 }
 0xa47   :  { %2425 = vpow2.f32 %v2293_v15  ;;  %v2294_v29 = vmul.f32 -1.442695, %v895_v18 }
 0xa48   :  { %2427 = vtanh.f32 %v895_v18  ;;  %v1157_v18 = vld [vmem:[%s3650_s4 + $0x38] sm:$0xff] }
 0xa54   :  { %v2426_v20 = vpop.eup %2425 }
 0xa55   :  { %v902_v22 = vadd.f32 1.0, %v2426_v20  ;;  %v2428_v24 = vpop.eup %2427  ;;  %v1156_v20 = vld [vmem:[%s3650_s4 + $0x30] sm:$0xff] }
 0xa57   :  { %2429 = vrcp.f32 %v902_v22  ;;  %v1155_v22 = vld [vmem:[%s3650_s4 + $0x28] sm:$0xff] }
 0xa58   :  { %2431 = vpow2.f32 %v2294_v29  ;;  %v1151_v29 = vld [vmem:[%s3650_s4 + $0x8] sm:$0xff] }
 0xa64   :  { %v2430_v26 = vpop.eup %2429 }
 0xa65   :  { %v910_v28 = vmul.f32 %v2430_v26, %v2428_v24  ;;  %v2432_v30 = vpop.eup %2431  ;;  %v909_v33 = vmul.f32 %v2430_v26, %v806_v9  ;;  %v1154_v24 = vld [vmem:[%s3650_s4 + $0x20] sm:$0xff]  ;;  %v1153_v26 = vld [vmem:[%s3650_s4 + $0x18] sm:$0xff] }
 0xa66   :  { %v903_v31 = vadd.f32 1.0, %v2432_v30  ;;  %v1150_v30 = vld [vmem:[%s3650_s4] sm:$0xff] }
 0xa67   :  { %912 = vrot.lane.b32.xlu0 %v910_v28, %s2558_s3  ;;  %v1152_v28 = vld [vmem:[%s3650_s4 + $0x10] sm:$0xff] }
 0xa68   :  { %2433 = vrcp.f32 %v903_v31 }
 0xa75   :  { %v2434_v59 = vpop.eup %2433 }
 0xad9   :  { %v913_v34 = vpop.permute.xlu0 %912 }
 0xada   :  { %v915_v56 = vadd.f32 %v913_v34, %v909_v33 }
 0xadc   :  { %2435 = vtanh.f32 %v915_v56 }
 0xae9   :  { %v2436_v17 = vpop.eup %2435 }
 0xaea   :  { %v917_v25 = vmul.f32 %v2436_v17, %v2434_v59  ;;  %v3195_v59 = vld [vmem:[%s3651_s5 + $0x70] sm:$0xff]  ;;  %v3200_v17 = vld [vmem:[%s3651_s5 + $0x68] sm:$0xff] }
 0xaec   :  { %919 = vrot.lane.b32.xlu1 %v917_v25, %s2558_s3  ;;  %v3209_v25 = vld [vmem:[%s3651_s5 + $0x60] sm:$0xff] }
 0xb5e   :  { %v920_v32 = vpop.permute.xlu1 %919 }
 0xb5f   :  { %922 = vst.msk [vmem:[#allocation3 + $0x28] sm:$0xff] %vm375_vm3, %v920_v32  ;;  %2295 = vmatmul.mubr.msk.f32.vlgmr.msra.gmra.mxu0 %vm97_vm0, %v920_v32 }
 0xb60   :  { %923 = vst.msk [vmem:[#allocation3 + $0x10] sm:$0xff] %vm377_vm4, %v920_v32  ;;  %1266 = vmatprep.mubr.f32.mxu0 %v2557_v3  ;;  %1219 = vmatpush1.msra.mxu0 %v1164_v53  ;;  %v3214_v32 = vld [vmem:[%s3651_s5 + $0x58] sm:$0xff] }
 0xb61   :  { %1220 = vmatprep.subr.mxu0 %v1163_v60 }
 0xb62   :  { %1221 = vmatpush1.msra.mxu0 %v1162_v61 }
 0xc1f   :  { %v998_v38 = vpop.f32.mrf.mxu0 }
 0xc20   :  { %v1003_v55 = vadd.f32 %v998_v38, %v928_v44  ;;  %v3219_v38 = vld [vmem:[%s3651_s5 + $0x50] sm:$0xff] }
 0xc21   :  { %v1000_v43 = vpop.f32.mrf.mxu0 }
 0xc22   :  { %v2296_v49 = vmul.f32 -1.442695, %v1003_v55  ;;  %v1004_v37 = vadd.f32 %v1000_v43, %v929_v57  ;;  %v3225_v55 = vld [vmem:[%s3651_s5 + $0x48] sm:$0xff]  ;;  %v3238_v43 = vld [vmem:[%s3651_s5 + $0x38] sm:$0xff] }
 0xc24   :  { %2437 = vpow2.f32 %v2296_v49  ;;  %v2297_v51 = vmul.f32 -1.442695, %v1004_v37  ;;  %v3233_v49 = vld [vmem:[%s3651_s5 + $0x40] sm:$0xff] }
 0xc25   :  { %2439 = vtanh.f32 %v1004_v37  ;;  %v3243_v37 = vld [vmem:[%s3651_s5 + $0x30] sm:$0xff] }
 0xc31   :  { %v2438_v19 = vpop.eup %2437 }
 0xc32   :  { %v1011_v58 = vadd.f32 1.0, %v2438_v19  ;;  %v2440_v48 = vpop.eup %2439  ;;  %v3249_v19 = vld [vmem:[%s3651_s5 + $0x28] sm:$0xff] }
 0xc34   :  { %2441 = vrcp.f32 %v1011_v58  ;;  %v3257_v58 = vld [vmem:[%s3651_s5 + $0x20] sm:$0xff] }
 0xc35   :  { %2443 = vpow2.f32 %v2297_v51  ;;  %v3281_v51 = vld [vmem:[%s3651_s5] sm:$0xff] }
 0xc41   :  { %v2442_v45 = vpop.eup %2441 }
 0xc42   :  { %v1019_v14 = vmul.f32 %v2442_v45, %v2440_v48  ;;  %v2444_v36 = vpop.eup %2443  ;;  %v1018_v0 = vmul.f32 %v2442_v45, %v915_v56  ;;  %v3190_v56 = vld [vmem:[%s3651_s5 + $0x78] sm:$0xff]  ;;  %v3267_v45 = vld [vmem:[%s3651_s5 + $0x10] sm:$0xff] }
 0xc43   :  { %v1012_v44 = vadd.f32 1.0, %v2444_v36  ;;  %1369 = vmatprep.subr.mxu1 %v3190_v56  ;;  %v3262_v48 = vld [vmem:[%s3651_s5 + $0x18] sm:$0xff] }
 0xc44   :  { %1021 = vrot.lane.b32.xlu0 %v1019_v14, %s2558_s3  ;;  %v3273_v14 = vld [vmem:[%s3651_s5 + $0x8] sm:$0xff] }
 0xc45   :  { %2445 = vrcp.f32 %v1012_v44 }
 0xc52   :  { %v2446_v54 = vpop.eup %2445 }
 0xcb6   :  { %v1022_v4 = vpop.permute.xlu0 %1021 }
 0xcb7   :  { %v1024_v7 = vadd.f32 %v1022_v4, %v1018_v0  ;;  %v1144_v4 = vld [vmem:[#allocation3 + $0x10] sm:$0xff] }
 0xcb9   :  { %2447 = vtanh.f32 %v1024_v7 }
 0xcc6   :  { %v2448_v40 = vpop.eup %2447 }
 0xcc7   :  { %v1026_v57 = vmul.f32 %v2448_v40, %v2446_v54  ;;  %v1146_v54 = vld [vmem:[#allocation3 + $0x20] sm:$0xff]  ;;  %v1147_v40 = vld [vmem:[#allocation3 + $0x28] sm:$0xff] }
 0xcc9   :  { %1028 = vrot.lane.b32.xlu1 %v1026_v57, %s2558_s3 }
 0xd3b   :  { %v1029_v50 = vpop.permute.xlu1 %1028 }
 0xd3c   :  { %1031 = vst.msk [vmem:[#allocation3 + $0x30] sm:$0xff] %vm375_vm3, %v1029_v50  ;;  %2298 = vmatmul.mubr.msk.f32.vlgmr.msra.gmra.mxu1 %vm97_vm0, %v1029_v50 }
 0xd3d   :  { %1032 = vst.msk [vmem:[#allocation3 + $0x8] sm:$0xff] %vm377_vm4, %v1029_v50  ;;  %1417 = vmatprep.mubr.f32.mxu1 %v2557_v3  ;;  %1370 = vmatpush1.msra.mxu1 %v3195_v59 }
 0xd3e   :  { %1371 = vmatprep.subr.mxu1 %v3200_v17 }
 0xd3f   :  { %1372 = vmatpush1.msra.mxu1 %v3209_v25 }
 0xd40   :  { %1373 = vmatprep.subr.mxu1 %v3214_v32 }
 0xd41   :  { %1374 = vmatpush1.msra.mxu1 %v3219_v38 }
 0xd42   :  { %1375 = vmatprep.subr.mxu1 %v3225_v55 }
 0xd43   :  { %1376 = vmatpush1.msra.mxu1 %v3233_v49  ;;  %v1148_v57 = vld [vmem:[#allocation3 + $0x30] sm:$0xff] }
 0xd44   :  { %1377 = vmatprep.subr.mxu1 %v3238_v43  ;;  %v1143_v0 = vld [vmem:[#allocation3 + $0x8] sm:$0xff] }
 0xd45   :  { %1378 = vmatpush1.msra.mxu1 %v3243_v37 }
 0xd46   :  { %1379 = vmatprep.subr.mxu1 %v3249_v19 }
 0xd47   :  { %1380 = vmatpush1.msra.mxu1 %v3257_v58 }
 0xd48   :  { %1381 = vmatprep.subr.mxu1 %v3262_v48 }
 0xd49   :  { %1382 = vmatpush1.msra.mxu1 %v3267_v45 }
 0xd4a   :  { %1383 = vmatprep.subr.mxu1 %v3273_v14 }
 0xd4b   :  { %1384 = vmatpush1.msra.mxu1 %v3281_v51 }
 0xd4c   :  { %1418 = vmatmul.mubr.f32.vlgmr.msra.gmra.mxu1 %v2557_v3  ;;  %1475 = vmatprep.subr.mxu1 %v3190_v56 }
 0xd4d   :  { %1476 = vmatpush1.msra.mxu1 %v3195_v59  ;;  %1523 = vmatprep.mubr.f32.mxu1 %v2557_v3 }
 0xd4e   :  { %1477 = vmatprep.subr.mxu1 %v3200_v17 }
 0xd4f   :  { %1478 = vmatpush1.msra.mxu1 %v3209_v25 }
 0xd50   :  { %1479 = vmatprep.subr.mxu1 %v3214_v32 }
 0xd51   :  { %1480 = vmatpush1.msra.mxu1 %v3219_v38 }
 0xd52   :  { %1481 = vmatprep.subr.mxu1 %v3225_v55 }
 0xd53   :  { %1482 = vmatpush1.msra.mxu1 %v3233_v49 }
 0xd54   :  { %1483 = vmatprep.subr.mxu1 %v3238_v43 }
 0xd55   :  { %1484 = vmatpush1.msra.mxu1 %v3243_v37 }
 0xd56   :  { %1485 = vmatprep.subr.mxu1 %v3249_v19 }
 0xd57   :  { %1486 = vmatpush1.msra.mxu1 %v3257_v58 }
 0xd58   :  { %1487 = vmatprep.subr.mxu1 %v3262_v48 }
 0xd59   :  { %1488 = vmatpush1.msra.mxu1 %v3267_v45 }
 0xd5a   :  { %1489 = vmatprep.subr.mxu1 %v3273_v14 }
 0xd5b   :  { %1490 = vmatpush1.msra.mxu1 %v3281_v51 }
 0xd5c   :  { %1687 = vmatprep.subr.mxu1 %v3190_v56 }
 0xdfc   :  { %v1107_v41 = vpop.f32.mrf.mxu1 }
 0xdfd   :  { %v1112_v23 = vadd.f32 %v1107_v41, %v1037_v63  ;;  %v1161_v63 = vld [vmem:[%s3650_s4 + $0x58] sm:$0xff]  ;;  %v1166_v41 = vld [vmem:[%s3652_s6] sm:$0x3] }
 0xdfe   :  { %v1109_v35 = vpop.f32.mrf.mxu1  ;;  %1222 = vmatprep.subr.mxu0 %v1161_v63 }
 0xdff   :  { %v2299_v10 = vmul.f32 -1.442695, %v1112_v23  ;;  %v1113_v62 = vadd.f32 %v1109_v35, %v1038_v47  ;;  %v1160_v47 = vld [vmem:[%s3650_s4 + $0x50] sm:$0xff]  ;;  %v3662_v35 = vsub.s32 0, %v2832_v42 }
 0xe00   :  { %1223 = vmatpush1.msra.mxu0 %v1160_v47 }
 0xe01   :  { %2449 = vpow2.f32 %v2299_v10  ;;  %1224 = vmatprep.subr.mxu0 %v1159_v1  ;;  %v2300_v21 = vmul.f32 -1.442695, %v1113_v62 }
 0xe02   :  { %2451 = vtanh.f32 %v1113_v62  ;;  %1225 = vmatpush1.msra.mxu0 %v1158_v8  ;;  %v1171_v62 = vrot.slane %v1166_v41, %v3662_v35 }
 0xe03   :  { %1226 = vmatprep.subr.mxu0 %v1157_v18 }
 0xe04   :  { %1227 = vmatpush1.msra.mxu0 %v1156_v20 }
 0xe05   :  { %1228 = vmatprep.subr.mxu0 %v1155_v22 }
 0xe06   :  { %1229 = vmatpush1.msra.mxu0 %v1154_v24 }
 0xe07   :  { %1230 = vmatprep.subr.mxu0 %v1153_v26 }
 0xe08   :  { %1231 = vmatpush1.msra.mxu0 %v1152_v28 }
 0xe09   :  { %1232 = vmatprep.subr.mxu0 %v1151_v29 }
 0xe0a   :  { %1233 = vmatpush1.msra.mxu0 %v1150_v30 }
 0xe0b   :  { %1581 = vmatprep.subr.mxu0 %v3190_v56 }
 0xe0e   :  { %v2450_v5 = vpop.eup %2449 }
 0xe0f   :  { %v1120_v11 = vadd.f32 1.0, %v2450_v5  ;;  %v2452_v46 = vpop.eup %2451 }
 0xe11   :  { %2453 = vrcp.f32 %v1120_v11  ;;  %v3663_v11 = vsub.s32 1, %v2832_v42 }
 0xe12   :  { %2455 = vpow2.f32 %v2300_v21 }
 0xe1e   :  { %v2454_v27 = vpop.eup %2453 }
 0xe1f   :  { %v1128_v9 = vmul.f32 %v2454_v27, %v2452_v46  ;;  %v2456_v39 = vpop.eup %2455  ;;  %v1127_v13 = vmul.f32 %v2454_v27, %v1024_v7  ;;  %v1145_v7 = vld [vmem:[#allocation3 + $0x18] sm:$0xff]  ;;  %v1175_v46 = vrot.slane %v1166_v41, %v3663_v11 }
 0xe20   :  { %v1121_v12 = vadd.f32 1.0, %v2456_v39 }
 0xe21   :  { %1130 = vrot.lane.b32.xlu0 %v1128_v9, %s2558_s3 }
 0xe22   :  { %2457 = vrcp.f32 %v1121_v12 }
 0xe2f   :  { %v2458_v31 = vpop.eup %2457 }
 0xe93   :  { %v1131_v15 = vpop.permute.xlu0 %1130 }
 0xe94   :  { %v1133_v16 = vadd.f32 %v1131_v15, %v1127_v13 }
 0xe96   :  { %2459 = vtanh.f32 %v1133_v16 }
 0xea3   :  { %v2460_v33 = vpop.eup %2459 }
 0xea4   :  { %v1135_v34 = vmul.f32 %v2460_v33, %v2458_v31 }
 0xea6   :  { %1137 = vrot.lane.b32.xlu1 %v1135_v34, %s2558_s3 }
 0xf18   :  { %v1138_v36 = vpop.permute.xlu1 %1137 }
 0xf19   :  { %1140 = vst.msk [vmem:[#allocation3 + $0x38] sm:$0xff] %vm375_vm3, %v1138_v36 }
 0xf1a   :  { %1141 = vst.msk [vmem:[#allocation3] sm:$0xff] %vm377_vm4, %v1138_v36 }
 0xf20   :  { %v1149_v50 = vld [vmem:[#allocation3 + $0x38] sm:$0xff] }
 0xf21   :  { %v1142_v44 = vld [vmem:[#allocation3] sm:$0xff] }
 0xf22   :  { %2301 = vmatmul.mubr.msk.f32.vlgmr.msra.gmra.mxu0 %vm97_vm0, %v1142_v44 }
 0xf23   :  { %1272 = vmatprep.mubr.f32.mxu0 %v2557_v3  ;;  %1582 = vmatpush1.msra.mxu0 %v3195_v59 }
 0xf24   :  { %1583 = vmatprep.subr.mxu0 %v3200_v17 }
 0xf25   :  { %1584 = vmatpush1.msra.mxu0 %v3209_v25 }
 0xf26   :  { %2302 = vmatmul.mubr.msk.f32.gmra.mxu0 %vm97_vm0, %v1143_v0  ;;  %1585 = vmatprep.subr.mxu0 %v3214_v32 }
 0xf27   :  { %1278 = vmatprep.mubr.f32.mxu0 %v2557_v3  ;;  %1586 = vmatpush1.msra.mxu0 %v3219_v38 }
 0xf28   :  { %1587 = vmatprep.subr.mxu0 %v3225_v55 }
 0xf29   :  { %1588 = vmatpush1.msra.mxu0 %v3233_v49 }
 0xf2a   :  { %2303 = vmatmul.mubr.msk.f32.gmra.mxu0 %vm97_vm0, %v1144_v4  ;;  %1589 = vmatprep.subr.mxu0 %v3238_v43 }
 0xf2b   :  { %1284 = vmatprep.mubr.f32.mxu0 %v2557_v3  ;;  %1590 = vmatpush1.msra.mxu0 %v3243_v37 }
 0xf2c   :  { %1591 = vmatprep.subr.mxu0 %v3249_v19 }
 0xf2d   :  { %1592 = vmatpush1.msra.mxu0 %v3257_v58 }
 0xf2e   :  { %2304 = vmatmul.mubr.msk.f32.gmra.mxu0 %vm97_vm0, %v1145_v7  ;;  %1593 = vmatprep.subr.mxu0 %v3262_v48 }
 0xf2f   :  { %1290 = vmatprep.mubr.f32.mxu0 %v2557_v3  ;;  %1594 = vmatpush1.msra.mxu0 %v3267_v45 }
 0xf30   :  { %1595 = vmatprep.subr.mxu0 %v3273_v14 }
 0xf31   :  { %1596 = vmatpush1.msra.mxu0 %v3281_v51 }
 0xf32   :  { %2305 = vmatmul.mubr.msk.f32.gmra.mxu0 %vm97_vm0, %v1146_v54  ;;  %1789 = vmatprep.subr.mxu0 %v3190_v56 }
 0xf33   :  { %1296 = vmatprep.mubr.f32.mxu0 %v2557_v3 }
 0xf36   :  { %2306 = vmatmul.mubr.msk.f32.gmra.mxu0 %vm97_vm0, %v1147_v40 }
 0xf37   :  { %1302 = vmatprep.mubr.f32.mxu0 %v2557_v3 }
 0xf3a   :  { %2307 = vmatmul.mubr.msk.f32.gmra.mxu0 %vm97_vm0, %v1148_v57 }
 0xf3b   :  { %1308 = vmatprep.mubr.f32.mxu0 %v2557_v3 }
 0xf3e   :  { %2308 = vmatmul.mubr.msk.f32.gmra.mxu0 %vm97_vm0, %v1149_v50 }
 0xf3f   :  { %1629 = vmatprep.mubr.f32.mxu0 %v2557_v3 }
 0xfe2   :  { %v1268_v23 = vpop.f32.mrf.mxu0 }
 0xfe3   :  { %v3408_v40 = vadd.f32 %v1268_v23, %v1171_v62 }
 0xfe4   :  { %v1270_v10 = vpop.f32.mrf.mxu0 }
 0xfe6   :  { %v1274_v5 = vpop.f32.mrf.mxu0 }
 0xfe7   :  { %v3344_v27 = vadd.f32 %v1274_v5, %v1171_v62  ;;  %v3420_v5 = vadd.f32 %v1270_v10, %v1175_v46 }
 0xfe8   :  { %v1276_v9 = vpop.f32.mrf.mxu0 }
 0xfe9   :  { %v3346_v52 = vadd.f32 %v1276_v9, %v1175_v46 }
 0xfea   :  { %v1280_v53 = vpop.f32.mrf.mxu0 }
 0xfeb   :  { %v3348_v60 = vadd.f32 %v1280_v53, %v1171_v62 }
 0xfec   :  { %v1282_v61 = vpop.f32.mrf.mxu0 }
 0xfed   :  { %v3350_v63 = vadd.f32 %v1282_v61, %v1175_v46 }
 0xfee   :  { %v1286_v47 = vpop.f32.mrf.mxu0 }
 0xfef   :  { %v3352_v1 = vadd.f32 %v1286_v47, %v1171_v62 }
 0xff0   :  { %v1288_v8 = vpop.f32.mrf.mxu0 }
 0xff1   :  { %v3354_v21 = vadd.f32 %v1288_v8, %v1175_v46 }
 0xff2   :  { %v1292_v39 = vpop.f32.mrf.mxu0 }
 0xff3   :  { %v3356_v42 = vadd.f32 %v1292_v39, %v1171_v62 }
 0xff4   :  { %v1294_v12 = vpop.f32.mrf.mxu0 }
 0xff5   :  { %v3358_v13 = vadd.f32 %v1294_v12, %v1175_v46  ;;  %v1664_v15 = vsel %vm2855_vm1, %v3352_v1, %v3356_v42  ;;  %v1766_v16 = vsel %vm2855_vm1, %v3356_v42, %v3352_v1 }
 0xff6   :  { %v1298_v18 = vpop.f32.mrf.mxu0 }
 0xff7   :  { %v3368_v20 = vadd.f32 %v1298_v18, %v1171_v62  ;;  %v1665_v22 = vsel %vm2861_vm2, %v3354_v21, %v3358_v13  ;;  %v1767_v24 = vsel %vm2861_vm2, %v3358_v13, %v3354_v21 }
 0xff8   :  { %v1300_v26 = vpop.f32.mrf.mxu0 }
 0xff9   :  { %v3378_v28 = vadd.f32 %v1300_v26, %v1175_v46  ;;  %v1558_v29 = vsel %vm2855_vm1, %v3348_v60, %v3368_v20  ;;  %v1868_v30 = vsel %vm2855_vm1, %v3368_v20, %v3348_v60 }
 0xffa   :  { %v1304_v31 = vpop.f32.mrf.mxu0 }
 0xffb   :  { %v3388_v33 = vadd.f32 %v1304_v31, %v1171_v62  ;;  %v1559_v34 = vsel %vm2861_vm2, %v3350_v63, %v3378_v28  ;;  %v1869_v36 = vsel %vm2861_vm2, %v3378_v28, %v3350_v63 }
 0xffc   :  { %v1306_v44 = vpop.f32.mrf.mxu0 }
 0xffd   :  { %v3398_v0 = vadd.f32 %v1306_v44, %v1175_v46  ;;  %v1452_v4 = vsel %vm2855_vm1, %v3344_v27, %v3388_v33  ;;  %v1970_v7 = vsel %vm2855_vm1, %v3388_v33, %v3344_v27 }
 0xffe   :  { %v1310_v54 = vpop.f32.mrf.mxu0 }
 0xfff   :  { %v3410_v57 = vadd.f32 %v1310_v54, %v1171_v62  ;;  %v1453_v50 = vsel %vm2861_vm2, %v3346_v52, %v3398_v0  ;;  %v1971_v41 = vsel %vm2861_vm2, %v3398_v0, %v3346_v52  ;;  %v1419_v62 = vpop.f32.mrf.mxu1 }
0x1000   :  { %v1312_v35 = vpop.f32.mrf.mxu0 }
0x1001   :  { %v1351_v23 = vsel %vm2855_vm1, %v3408_v40, %v3410_v57  ;;  %v3426_v11 = vadd.f32 %v1312_v35, %v1175_v46  ;;  %v2072_v9 = vsel %vm2855_vm1, %v3410_v57, %v3408_v40  ;;  %v1421_v46 = vpop.f32.mrf.mxu1  ;;  %v2181_v40 = vld [vmem:[%s3653_s7 + $0x38] sm:$0xff]  ;;  %v2179_v57 = vld [vmem:[%s3653_s7 + $0x28] sm:$0xff] }
0x1002   :  { %v1424_v53 = vadd.f32 %v1419_v62, %v1351_v23 }
0x1003   :  { %v1352_v47 = vsel %vm2861_vm2, %v3420_v5, %v3426_v11 }
0x1004   :  { %v2309_v61 = vmul.f32 -1.442695, %v1424_v53  ;;  %v1425_v8 = vadd.f32 %v1421_v46, %v1352_v47 }
0x1006   :  { %2461 = vpow2.f32 %v2309_v61  ;;  %v2310_v44 = vmul.f32 -1.442695, %v1425_v8 }
0x1007   :  { %2463 = vtanh.f32 %v1425_v8 }
0x1013   :  { %v2462_v39 = vpop.eup %2461 }
0x1014   :  { %v1432_v12 = vadd.f32 1.0, %v2462_v39  ;;  %v2464_v18 = vpop.eup %2463 }
0x1016   :  { %2465 = vrcp.f32 %v1432_v12 }
0x1017   :  { %2467 = vpow2.f32 %v2310_v44 }
0x1023   :  { %v2466_v26 = vpop.eup %2465 }
0x1024   :  { %v1440_v31 = vmul.f32 %v2466_v26, %v2464_v18  ;;  %v2468_v54 = vpop.eup %2467  ;;  %v1439_v23 = vmul.f32 0.0, %v2466_v26 }
0x1025   :  { %v1433_v35 = vadd.f32 1.0, %v2468_v54 }
0x1026   :  { %1442 = vrot.lane.b32.xlu0 %v1440_v31, %s2558_s3 }
0x1027   :  { %2469 = vrcp.f32 %v1433_v35 }
0x1034   :  { %v2470_v61 = vpop.eup %2469 }
0x1098   :  { %v1443_v62 = vpop.permute.xlu0 %1442 }
0x1099   :  { %v1445_v53 = vadd.f32 %v1443_v62, %v1439_v23 }
0x109b   :  { %2471 = vtanh.f32 %v1445_v53 }
0x10a8   :  { %v2472_v47 = vpop.eup %2471 }
0x10a9   :  { %v1447_v46 = vmul.f32 %v2472_v47, %v2470_v61 }
0x10ab   :  { %1455 = vrot.lane.b32.xlu1 %v1447_v46, %s2558_s3 }
0x111d   :  { %v1456_v39 = vpop.permute.xlu1 %1455 }
0x111e   :  { %2311 = vmatmul.mubr.msk.f32.vlgmr.msra.gmra.mxu1 %vm97_vm0, %v1456_v39 }
0x111f   :  { %1688 = vmatpush1.msra.mxu1 %v3195_v59  ;;  %1735 = vmatprep.mubr.f32.mxu1 %v2557_v3 }
0x1120   :  { %1689 = vmatprep.subr.mxu1 %v3200_v17 }
0x1121   :  { %1690 = vmatpush1.msra.mxu1 %v3209_v25 }
0x1122   :  { %1691 = vmatprep.subr.mxu1 %v3214_v32 }
0x1123   :  { %1692 = vmatpush1.msra.mxu1 %v3219_v38 }
0x1124   :  { %1693 = vmatprep.subr.mxu1 %v3225_v55 }
0x1125   :  { %1694 = vmatpush1.msra.mxu1 %v3233_v49 }
0x1126   :  { %1695 = vmatprep.subr.mxu1 %v3238_v43 }
0x1127   :  { %1696 = vmatpush1.msra.mxu1 %v3243_v37 }
0x1128   :  { %1697 = vmatprep.subr.mxu1 %v3249_v19 }
0x1129   :  { %1698 = vmatpush1.msra.mxu1 %v3257_v58 }
0x112a   :  { %1699 = vmatprep.subr.mxu1 %v3262_v48 }
0x112b   :  { %1700 = vmatpush1.msra.mxu1 %v3267_v45 }
0x112c   :  { %1701 = vmatprep.subr.mxu1 %v3273_v14 }
0x112d   :  { %1702 = vmatpush1.msra.mxu1 %v3281_v51 }
0x112e   :  { %1891 = vmatprep.subr.mxu1 %v3190_v56 }
0x11de   :  { %v1525_v8 = vpop.f32.mrf.mxu1 }
0x11df   :  { %v1530_v12 = vadd.f32 %v1525_v8, %v1452_v4 }
0x11e0   :  { %v1527_v26 = vpop.f32.mrf.mxu1 }
0x11e1   :  { %v2312_v18 = vmul.f32 -1.442695, %v1530_v12  ;;  %v1531_v31 = vadd.f32 %v1527_v26, %v1453_v50 }
0x11e3   :  { %2473 = vpow2.f32 %v2312_v18  ;;  %v2313_v61 = vmul.f32 -1.442695, %v1531_v31 }
0x11e4   :  { %2475 = vtanh.f32 %v1531_v31 }
0x11f0   :  { %v2474_v44 = vpop.eup %2473 }
0x11f1   :  { %v1538_v54 = vadd.f32 1.0, %v2474_v44  ;;  %v2476_v35 = vpop.eup %2475 }
0x11f3   :  { %2477 = vrcp.f32 %v1538_v54 }
0x11f4   :  { %2479 = vpow2.f32 %v2313_v61 }
0x1200   :  { %v2478_v23 = vpop.eup %2477 }
0x1201   :  { %v1546_v62 = vmul.f32 %v2478_v23, %v2476_v35  ;;  %v2480_v47 = vpop.eup %2479  ;;  %v1545_v39 = vmul.f32 %v2478_v23, %v1445_v53 }
0x1202   :  { %v1539_v46 = vadd.f32 1.0, %v2480_v47 }
0x1203   :  { %1548 = vrot.lane.b32.xlu0 %v1546_v62, %s2558_s3 }
0x1204   :  { %2481 = vrcp.f32 %v1539_v46 }
0x1211   :  { %v2482_v8 = vpop.eup %2481 }
0x1275   :  { %v1549_v10 = vpop.permute.xlu0 %1548 }
0x1276   :  { %v1551_v4 = vadd.f32 %v1549_v10, %v1545_v39 }
0x1278   :  { %2483 = vtanh.f32 %v1551_v4 }
0x1285   :  { %v2484_v50 = vpop.eup %2483 }
0x1286   :  { %v1553_v12 = vmul.f32 %v2484_v50, %v2482_v8 }
0x1288   :  { %1561 = vrot.lane.b32.xlu1 %v1553_v12, %s2558_s3 }
0x12fa   :  { %v1562_v18 = vpop.permute.xlu1 %1561 }
0x12fb   :  { %2314 = vmatmul.mubr.msk.f32.vlgmr.msra.gmra.mxu0 %vm97_vm0, %v1562_v18 }
0x12fc   :  { %1790 = vmatpush1.msra.mxu0 %v3195_v59  ;;  %1837 = vmatprep.mubr.f32.mxu0 %v2557_v3 }
0x12fd   :  { %1791 = vmatprep.subr.mxu0 %v3200_v17 }
0x12fe   :  { %1792 = vmatpush1.msra.mxu0 %v3209_v25 }
0x12ff   :  { %1793 = vmatprep.subr.mxu0 %v3214_v32 }
0x1300   :  { %1794 = vmatpush1.msra.mxu0 %v3219_v38 }
0x1301   :  { %1795 = vmatprep.subr.mxu0 %v3225_v55 }
0x1302   :  { %1796 = vmatpush1.msra.mxu0 %v3233_v49 }
0x1303   :  { %1797 = vmatprep.subr.mxu0 %v3238_v43 }
0x1304   :  { %1798 = vmatpush1.msra.mxu0 %v3243_v37 }
0x1305   :  { %1799 = vmatprep.subr.mxu0 %v3249_v19 }
0x1306   :  { %1800 = vmatpush1.msra.mxu0 %v3257_v58 }
0x1307   :  { %1801 = vmatprep.subr.mxu0 %v3262_v48 }
0x1308   :  { %1802 = vmatpush1.msra.mxu0 %v3267_v45 }
0x1309   :  { %1803 = vmatprep.subr.mxu0 %v3273_v14 }
0x130a   :  { %1804 = vmatpush1.msra.mxu0 %v3281_v51 }
0x130b   :  { %1993 = vmatprep.subr.mxu0 %v3190_v56 }
0x13bb   :  { %v1631_v10 = vpop.f32.mrf.mxu0 }
0x13bc   :  { %v1636_v53 = vadd.f32 %v1631_v10, %v1558_v29 }
0x13bd   :  { %v1633_v31 = vpop.f32.mrf.mxu0 }
0x13be   :  { %v2315_v26 = vmul.f32 -1.442695, %v1636_v53  ;;  %v1637_v44 = vadd.f32 %v1633_v31, %v1559_v34 }
0x13c0   :  { %2485 = vpow2.f32 %v2315_v26  ;;  %v2316_v47 = vmul.f32 -1.442695, %v1637_v44 }
0x13c1   :  { %2487 = vtanh.f32 %v1637_v44 }
0x13cd   :  { %v2486_v54 = vpop.eup %2485 }
0x13ce   :  { %v1644_v35 = vadd.f32 1.0, %v2486_v54  ;;  %v2488_v23 = vpop.eup %2487 }
0x13d0   :  { %2489 = vrcp.f32 %v1644_v35 }
0x13d1   :  { %2491 = vpow2.f32 %v2316_v47 }
0x13dd   :  { %v2490_v62 = vpop.eup %2489 }
0x13de   :  { %v1652_v61 = vmul.f32 %v2490_v62, %v2488_v23  ;;  %v2492_v29 = vpop.eup %2491  ;;  %v1651_v39 = vmul.f32 %v2490_v62, %v1551_v4 }
0x13df   :  { %v1645_v46 = vadd.f32 1.0, %v2492_v29 }
0x13e0   :  { %1654 = vrot.lane.b32.xlu0 %v1652_v61, %s2558_s3 }
0x13e1   :  { %2493 = vrcp.f32 %v1645_v46 }
0x13ee   :  { %v2494_v12 = vpop.eup %2493 }
0x1452   :  { %v1655_v8 = vpop.permute.xlu0 %1654 }
0x1453   :  { %v1657_v50 = vadd.f32 %v1655_v8, %v1651_v39 }
0x1455   :  { %2495 = vtanh.f32 %v1657_v50 }
0x1462   :  { %v2496_v34 = vpop.eup %2495 }
0x1463   :  { %v1659_v18 = vmul.f32 %v2496_v34, %v2494_v12 }
0x1465   :  { %1667 = vrot.lane.b32.xlu1 %v1659_v18, %s2558_s3 }
0x14d7   :  { %v1668_v10 = vpop.permute.xlu1 %1667 }
0x14d8   :  { %2317 = vmatmul.mubr.msk.f32.vlgmr.msra.gmra.mxu1 %vm97_vm0, %v1668_v10 }
0x14d9   :  { %1892 = vmatpush1.msra.mxu1 %v3195_v59  ;;  %1939 = vmatprep.mubr.f32.mxu1 %v2557_v3 }
0x14da   :  { %1893 = vmatprep.subr.mxu1 %v3200_v17 }
0x14db   :  { %1894 = vmatpush1.msra.mxu1 %v3209_v25 }
0x14dc   :  { %1895 = vmatprep.subr.mxu1 %v3214_v32 }
0x14dd   :  { %1896 = vmatpush1.msra.mxu1 %v3219_v38 }
0x14de   :  { %1897 = vmatprep.subr.mxu1 %v3225_v55 }
0x14df   :  { %1898 = vmatpush1.msra.mxu1 %v3233_v49 }
0x14e0   :  { %1899 = vmatprep.subr.mxu1 %v3238_v43 }
0x14e1   :  { %1900 = vmatpush1.msra.mxu1 %v3243_v37 }
0x14e2   :  { %1901 = vmatprep.subr.mxu1 %v3249_v19 }
0x14e3   :  { %1902 = vmatpush1.msra.mxu1 %v3257_v58 }
0x14e4   :  { %1903 = vmatprep.subr.mxu1 %v3262_v48 }
0x14e5   :  { %1904 = vmatpush1.msra.mxu1 %v3267_v45 }
0x14e6   :  { %1905 = vmatprep.subr.mxu1 %v3273_v14 }
0x14e7   :  { %1906 = vmatpush1.msra.mxu1 %v3281_v51 }
0x14e8   :  { %2095 = vmatprep.subr.mxu1 %v3190_v56 }
0x1598   :  { %v1737_v4 = vpop.f32.mrf.mxu1 }
0x1599   :  { %v1742_v53 = vadd.f32 %v1737_v4, %v1664_v15 }
0x159a   :  { %v1739_v31 = vpop.f32.mrf.mxu1 }
0x159b   :  { %v2318_v26 = vmul.f32 -1.442695, %v1742_v53  ;;  %v1743_v44 = vadd.f32 %v1739_v31, %v1665_v22 }
0x159d   :  { %2497 = vpow2.f32 %v2318_v26  ;;  %v2319_v61 = vmul.f32 -1.442695, %v1743_v44 }
0x159e   :  { %2499 = vtanh.f32 %v1743_v44 }
0x15aa   :  { %v2498_v54 = vpop.eup %2497 }
0x15ab   :  { %v1750_v35 = vadd.f32 1.0, %v2498_v54  ;;  %v2500_v56 = vpop.eup %2499 }
0x15ad   :  { %2501 = vrcp.f32 %v1750_v35 }
0x15ae   :  { %2503 = vpow2.f32 %v2319_v61 }
0x15ba   :  { %v2502_v23 = vpop.eup %2501 }
0x15bb   :  { %v1758_v62 = vmul.f32 %v2502_v23, %v2500_v56  ;;  %v2504_v15 = vpop.eup %2503  ;;  %v1757_v29 = vmul.f32 %v2502_v23, %v1657_v50 }
0x15bc   :  { %v1751_v47 = vadd.f32 1.0, %v2504_v15 }
0x15bd   :  { %1760 = vrot.lane.b32.xlu0 %v1758_v62, %s2558_s3 }
0x15be   :  { %2505 = vrcp.f32 %v1751_v47 }
0x15cb   :  { %v2506_v8 = vpop.eup %2505 }
0x162f   :  { %v1761_v46 = vpop.permute.xlu0 %1760 }
0x1630   :  { %v1763_v39 = vadd.f32 %v1761_v46, %v1757_v29 }
0x1632   :  { %2507 = vtanh.f32 %v1763_v39 }
0x163f   :  { %v2508_v22 = vpop.eup %2507 }
0x1640   :  { %v1765_v12 = vmul.f32 %v2508_v22, %v2506_v8 }
0x1642   :  { %1769 = vrot.lane.b32.xlu1 %v1765_v12, %s2558_s3 }
0x16b4   :  { %v1770_v34 = vpop.permute.xlu1 %1769 }
0x16b5   :  { %2320 = vmatmul.mubr.msk.f32.vlgmr.msra.gmra.mxu0 %vm97_vm0, %v1770_v34 }
0x16b6   :  { %1994 = vmatpush1.msra.mxu0 %v3195_v59  ;;  %2041 = vmatprep.mubr.f32.mxu0 %v2557_v3 }
0x16b7   :  { %1995 = vmatprep.subr.mxu0 %v3200_v17 }
0x16b8   :  { %1996 = vmatpush1.msra.mxu0 %v3209_v25 }
0x16b9   :  { %1997 = vmatprep.subr.mxu0 %v3214_v32 }
0x16ba   :  { %1998 = vmatpush1.msra.mxu0 %v3219_v38 }
0x16bb   :  { %1999 = vmatprep.subr.mxu0 %v3225_v55 }
0x16bc   :  { %2000 = vmatpush1.msra.mxu0 %v3233_v49 }
0x16bd   :  { %2001 = vmatprep.subr.mxu0 %v3238_v43 }
0x16be   :  { %2002 = vmatpush1.msra.mxu0 %v3243_v37 }
0x16bf   :  { %2003 = vmatprep.subr.mxu0 %v3249_v19 }
0x16c0   :  { %2004 = vmatpush1.msra.mxu0 %v3257_v58 }
0x16c1   :  { %2005 = vmatprep.subr.mxu0 %v3262_v48 }
0x16c2   :  { %2006 = vmatpush1.msra.mxu0 %v3267_v45 }
0x16c3   :  { %2007 = vmatprep.subr.mxu0 %v3273_v14 }
0x16c4   :  { %2008 = vmatpush1.msra.mxu0 %v3281_v51 }
0x16c5   :  { %2343 = vmatprep.subr.mxu0 %v2557_v3 }
0x1775   :  { %v1839_v50 = vpop.f32.mrf.mxu0 }
0x1776   :  { %v1844_v18 = vadd.f32 %v1839_v50, %v1766_v16 }
0x1777   :  { %v1841_v4 = vpop.f32.mrf.mxu0 }
0x1778   :  { %v2321_v10 = vmul.f32 -1.442695, %v1844_v18  ;;  %v1845_v53 = vadd.f32 %v1841_v4, %v1767_v24 }
0x177a   :  { %2509 = vpow2.f32 %v2321_v10  ;;  %v2322_v1 = vmul.f32 -1.442695, %v1845_v53 }
0x177b   :  { %2511 = vtanh.f32 %v1845_v53 }
0x1787   :  { %v2510_v26 = vpop.eup %2509 }
0x1788   :  { %v1852_v31 = vadd.f32 1.0, %v2510_v26  ;;  %v2512_v44 = vpop.eup %2511 }
0x178a   :  { %2513 = vrcp.f32 %v1852_v31 }
0x178b   :  { %2515 = vpow2.f32 %v2322_v1 }
0x1797   :  { %v2514_v54 = vpop.eup %2513 }
0x1798   :  { %v1860_v35 = vmul.f32 %v2514_v54, %v2512_v44  ;;  %v2516_v42 = vpop.eup %2515  ;;  %v1859_v56 = vmul.f32 %v2514_v54, %v1763_v39  ;;  %v3664_v54 = vsel %vm2861_vm2, %v3426_v11, %v3420_v5  ;;  %v2178_v5 = vld [vmem:[%s3653_s7 + $0x20] sm:$0xff]  ;;  %v2177_v11 = vld [vmem:[%s3653_s7 + $0x18] sm:$0xff] }
0x1799   :  { %v1853_v16 = vadd.f32 1.0, %v2516_v42 }
0x179a   :  { %1862 = vrot.lane.b32.xlu0 %v1860_v35, %s2558_s3 }
0x179b   :  { %2517 = vrcp.f32 %v1853_v16 }
0x17a8   :  { %v2518_v21 = vpop.eup %2517 }
0x180c   :  { %v1863_v23 = vpop.permute.xlu0 %1862 }
0x180d   :  { %v1865_v62 = vadd.f32 %v1863_v23, %v1859_v56  ;;  %v2175_v23 = vld [vmem:[%s3653_s7 + $0x8] sm:$0xff] }
0x180f   :  { %2519 = vtanh.f32 %v1865_v62 }
0x181c   :  { %v2520_v13 = vpop.eup %2519 }
0x181d   :  { %v1867_v24 = vmul.f32 %v2520_v13, %v2518_v21 }
0x181f   :  { %1871 = vrot.lane.b32.xlu1 %v1867_v24, %s2558_s3 }
0x1891   :  { %v1872_v61 = vpop.permute.xlu1 %1871 }
0x1892   :  { %2323 = vmatmul.mubr.msk.f32.vlgmr.msra.gmra.mxu1 %vm97_vm0, %v1872_v61 }
0x1893   :  { %2096 = vmatpush1.msra.mxu1 %v3195_v59  ;;  %2143 = vmatprep.mubr.f32.mxu1 %v2557_v3 }
0x1894   :  { %2097 = vmatprep.subr.mxu1 %v3200_v17 }
0x1895   :  { %2098 = vmatpush1.msra.mxu1 %v3209_v25 }
0x1896   :  { %2099 = vmatprep.subr.mxu1 %v3214_v32 }
0x1897   :  { %2100 = vmatpush1.msra.mxu1 %v3219_v38 }
0x1898   :  { %2101 = vmatprep.subr.mxu1 %v3225_v55 }
0x1899   :  { %2102 = vmatpush1.msra.mxu1 %v3233_v49 }
0x189a   :  { %2103 = vmatprep.subr.mxu1 %v3238_v43 }
0x189b   :  { %2104 = vmatpush1.msra.mxu1 %v3243_v37 }
0x189c   :  { %2105 = vmatprep.subr.mxu1 %v3249_v19 }
0x189d   :  { %2106 = vmatpush1.msra.mxu1 %v3257_v58 }
0x189e   :  { %2107 = vmatprep.subr.mxu1 %v3262_v48 }
0x189f   :  { %2108 = vmatpush1.msra.mxu1 %v3267_v45 }
0x18a0   :  { %2109 = vmatprep.subr.mxu1 %v3273_v14 }
0x18a1   :  { %2110 = vmatpush1.msra.mxu1 %v3281_v51 }
0x1952   :  { %v1941_v59 = vpop.f32.mrf.mxu1 }
0x1953   :  { %v1946_v17 = vadd.f32 %v1941_v59, %v1868_v30 }
0x1954   :  { %v1943_v32 = vpop.f32.mrf.mxu1 }
0x1955   :  { %v2324_v25 = vmul.f32 -1.442695, %v1946_v17  ;;  %v1947_v38 = vadd.f32 %v1943_v32, %v1869_v36 }
0x1957   :  { %2521 = vpow2.f32 %v2324_v25  ;;  %v2325_v58 = vmul.f32 -1.442695, %v1947_v38 }
0x1958   :  { %2523 = vtanh.f32 %v1947_v38 }
0x1964   :  { %v2522_v55 = vpop.eup %2521 }
0x1965   :  { %v1954_v49 = vadd.f32 1.0, %v2522_v55  ;;  %v2524_v43 = vpop.eup %2523 }
0x1967   :  { %2525 = vrcp.f32 %v1954_v49 }
0x1968   :  { %2527 = vpow2.f32 %v2325_v58 }
0x1974   :  { %v2526_v37 = vpop.eup %2525 }
0x1975   :  { %v1962_v19 = vmul.f32 %v2526_v37, %v2524_v43  ;;  %v2528_v48 = vpop.eup %2527  ;;  %v1961_v14 = vmul.f32 %v2526_v37, %v1865_v62  ;;  %v2174_v62 = vld [vmem:[%s3653_s7] sm:$0xff] }
0x1976   :  { %v1955_v45 = vadd.f32 1.0, %v2528_v48 }
0x1977   :  { %1964 = vrot.lane.b32.xlu0 %v1962_v19, %s2558_s3 }
0x1978   :  { %2529 = vrcp.f32 %v1955_v45 }
0x1985   :  { %v2530_v63 = vpop.eup %2529 }
0x19e9   :  { %v1965_v51 = vpop.permute.xlu0 %1964 }
0x19ea   :  { %v1967_v60 = vadd.f32 %v1965_v51, %v1961_v14 }
0x19ec   :  { %2531 = vtanh.f32 %v1967_v60 }
0x19f9   :  { %v2532_v20 = vpop.eup %2531 }
0x19fa   :  { %v1969_v28 = vmul.f32 %v2532_v20, %v2530_v63 }
0x19fc   :  { %1973 = vrot.lane.b32.xlu1 %v1969_v28, %s2558_s3 }
0x1a6e   :  { %v1974_v30 = vpop.permute.xlu1 %1973 }
0x1a6f   :  { %2326 = vmatmul.mubr.msk.f32.vlgmr.msra.gmra.mxu0 %vm97_vm0, %v1974_v30 }
0x1a70   :  { %2359 = vmatprep.mubr.msk.f32.mxu0 %vm2559_vm5, %v2557_v3  ;;  %2344 = vmatpush3.msra.mxu0 %v2181_v40 }
0x1a71   :  { %2345 = vmatprep.subr.mxu0 %v2557_v3 }
0x1a72   :  { %2346 = vmatpush3.msra.mxu0 %v2180_v6 }
0x1a73   :  { %2347 = vmatprep.subr.mxu0 %v2557_v3 }
0x1a74   :  { %2348 = vmatpush3.msra.mxu0 %v2179_v57 }
0x1a75   :  { %2349 = vmatprep.subr.mxu0 %v2557_v3 }
0x1a76   :  { %2350 = vmatpush3.msra.mxu0 %v2178_v5 }
0x1a77   :  { %2351 = vmatprep.subr.mxu0 %v2557_v3 }
0x1a78   :  { %2352 = vmatpush3.msra.mxu0 %v2177_v11 }
0x1a79   :  { %2353 = vmatprep.subr.mxu0 %v2557_v3 }
0x1b2f   :  { %v2043_v36 = vpop.f32.mrf.mxu0 }
0x1b30   :  { %v2048_v15 = vadd.f32 %v2043_v36, %v1970_v7 }
0x1b31   :  { %v2045_v29 = vpop.f32.mrf.mxu0 }
0x1b32   :  { %v2327_v47 = vmul.f32 -1.442695, %v2048_v15  ;;  %v2049_v46 = vadd.f32 %v2045_v29, %v1971_v41 }
0x1b34   :  { %2533 = vpow2.f32 %v2327_v47  ;;  %v2328_v27 = vmul.f32 -1.442695, %v2049_v46 }
0x1b35   :  { %2535 = vtanh.f32 %v2049_v46 }
0x1b41   :  { %v2534_v39 = vpop.eup %2533 }
0x1b42   :  { %v2056_v8 = vadd.f32 1.0, %v2534_v39  ;;  %v2536_v22 = vpop.eup %2535 }
0x1b44   :  { %2537 = vrcp.f32 %v2056_v8 }
0x1b45   :  { %2539 = vpow2.f32 %v2328_v27 }
0x1b51   :  { %v2538_v12 = vpop.eup %2537 }
0x1b52   :  { %v2064_v34 = vmul.f32 %v2538_v12, %v2536_v22  ;;  %v2540_v33 = vpop.eup %2539  ;;  %v2063_v50 = vmul.f32 %v2538_v12, %v1967_v60 }
0x1b53   :  { %v2057_v7 = vadd.f32 1.0, %v2540_v33 }
0x1b54   :  { %2066 = vrot.lane.b32.xlu0 %v2064_v34, %s2558_s3 }
0x1b55   :  { %2541 = vrcp.f32 %v2057_v7 }
0x1b62   :  { %v2542_v52 = vpop.eup %2541 }
0x1bc6   :  { %v2067_v18 = vpop.permute.xlu0 %2066 }
0x1bc7   :  { %v2069_v10 = vadd.f32 %v2067_v18, %v2063_v50 }
0x1bc9   :  { %2543 = vtanh.f32 %v2069_v10 }
0x1bd6   :  { %v2544_v0 = vpop.eup %2543 }
0x1bd7   :  { %v2071_v41 = vmul.f32 %v2544_v0, %v2542_v52 }
0x1bd9   :  { %2075 = vrot.lane.b32.xlu1 %v2071_v41, %s2558_s3 }
0x1c4b   :  { %v2076_v4 = vpop.permute.xlu1 %2075 }
0x1c4c   :  { %2329 = vmatmul.mubr.msk.f32.vlgmr.msra.gmra.mxu1 %vm97_vm0, %v2076_v4 }
0x1d0c   :  { %v2145_v53 = vpop.f32.mrf.mxu1 }
0x1d0d   :  { %v2150_v26 = vadd.f32 %v2145_v53, %v2072_v9  ;;  %v2176_v9 = vld [vmem:[%s3653_s7 + $0x10] sm:$0xff] }
0x1d0e   :  { %v2147_v44 = vpop.f32.mrf.mxu1  ;;  %2354 = vmatpush3.msra.mxu0 %v2176_v9 }
0x1d0f   :  { %v2330_v31 = vmul.f32 -1.442695, %v2150_v26  ;;  %v2151_v35 = vadd.f32 %v2147_v44, %v3664_v54  ;;  %2355 = vmatprep.subr.mxu0 %v2557_v3 }
0x1d10   :  { %2356 = vmatpush3.msra.mxu0 %v2175_v23 }
0x1d11   :  { %2545 = vpow2.f32 %v2330_v31  ;;  %2357 = vmatprep.subr.mxu0 %v2557_v3  ;;  %v2331_v21 = vmul.f32 -1.442695, %v2151_v35  ;;  %v2332_v3 = vld [vmem:[%s3654_s8] ss:$0 sm:$0xff] }
0x1d12   :  { %2547 = vtanh.f32 %v2151_v35  ;;  %2358 = vmatpush3.msra.mxu0 %v2174_v62 }
0x1d1e   :  { %v2546_v1 = vpop.eup %2545 }
0x1d1f   :  { %v2158_v42 = vadd.f32 1.0, %v2546_v1  ;;  %v2548_v16 = vpop.eup %2547 }
0x1d21   :  { %2549 = vrcp.f32 %v2158_v42 }
0x1d22   :  { %2551 = vpow2.f32 %v2331_v21 }
0x1d2e   :  { %v2550_v56 = vpop.eup %2549 }
0x1d2f   :  { %v2166_v2 = vmul.f32 %v2550_v56, %v2548_v16  ;;  %v2552_v13 = vpop.eup %2551  ;;  %v2165_v61 = vmul.f32 %v2550_v56, %v2069_v10 }
0x1d30   :  { %v2159_v24 = vadd.f32 1.0, %v2552_v13 }
0x1d31   :  { %2168 = vrot.lane.b32.xlu0 %v2166_v2, %s2558_s3 }
0x1d32   :  { %2553 = vrcp.f32 %v2159_v24 }
0x1d3f   :  { %v2554_v25 = vpop.eup %2553 }
0x1da3   :  { %v2169_v59 = vpop.permute.xlu0 %2168 }
0x1da4   :  { %v2171_v17 = vadd.f32 %v2169_v59, %v2165_v61 }
0x1da6   :  { %2555 = vtanh.f32 %v2171_v17 }
0x1db3   :  { %v2556_v32 = vpop.eup %2555 }
0x1db4   :  { %v2173_v38 = vmul.f32 %v2556_v32, %v2554_v25 }
0x1db6   :  { %2190 = vrot.lane.b32.xlu1 %v2173_v38, %s2558_s3 }
0x1e28   :  { %v2191_v55 = vpop.permute.xlu1 %2190 }
0x1e29   :  { %2360 = vmatmul.mubr.msk.f32.vlgmr.msra.gmra.mxu0 %vm97_vm0, %v2191_v55 }
0x1ee9   :  { %v2260_v49 = vpop.f32.mrf.mxu0 }
0x1eea   :  { %v2261_v43 = vadd.f32 %v2332_v3, %v2260_v49 }
0x1eeb   :  { %v2361_v37 = vpop.f32.mrf.mxu0 }
0x1eec   :  { %2265 = vst.msk [vmem:[%s3655_s9] sm:$0xff] %vm2264_vm6, %v2261_v43 }

</bundles_post_ra>
